<compile_context>
chip_gen: v7x
topology: tpu7x:2x2x1
jax: 0.10.0
libtpu: 0.0.40
codegen_flags: <defaults>
</compile_context>

<pallas_src>
import math

import jax
import jax.numpy as jnp
from jax.experimental import pallas as pl
from jax.experimental.pallas import tpu as pltpu


def _round_up(n, m):
    return ((n + m - 1) // m) * m


# ----------------------------------------------------------------------------
# Fused kernel factory: all LSTM layers + FC head in one pallas_call, no grid.
# Gate order follows PyTorch nn.LSTM: [i, f, g, o].
# ----------------------------------------------------------------------------
def make_fused_lstm_kernel(num_layers, seq_len, batch_pad, hidden):
    T, Bp, H = seq_len, batch_pad, hidden

    def kernel(*refs):
        # refs = [x_flat, (wihT_l, whhT_l, b_l) * num_layers, wfcT, bfc, out, (hseq_sc)]
        x_ref = refs[0]
        layer_refs = refs[1:1 + 3 * num_layers]
        wfc_ref, bfc_ref, out_ref = refs[1 + 3 * num_layers:1 + 3 * num_layers + 3]
        hseq_sc = refs[-1] if num_layers > 1 else None

        def cell(gates, c_prev):
            i_g = jax.nn.sigmoid(gates[:, 0 * H:1 * H])
            f_g = jax.nn.sigmoid(gates[:, 1 * H:2 * H])
            g_g = jnp.tanh(gates[:, 2 * H:3 * H])
            o_g = jax.nn.sigmoid(gates[:, 3 * H:4 * H])
            c_new = f_g * c_prev + i_g * g_g
            h_new = o_g * jnp.tanh(c_new)
            return h_new, c_new

        # Current layer's full input sequence, time-major flattened: (T*Bp, D_in).
        seq = x_ref[...]
        h = None
        for l in range(num_layers):
            wih_ref = layer_refs[3 * l + 0]   # (D_in, 4H)
            whh_ref = layer_refs[3 * l + 1]   # (H, 4H)
            b_ref = layer_refs[3 * l + 2]     # (1, 4H)  (= b_ih + b_hh)

            # Input projection for ALL timesteps in one MXU matmul (not on the
            # recurrent critical path).
            gx = jnp.dot(seq, wih_ref[...],
                         preferred_element_type=jnp.float32) + b_ref[...]  # (T*Bp, 4H)

            h = jnp.zeros((Bp, H), jnp.float32)
            c = jnp.zeros((Bp, H), jnp.float32)

            # Sequential recurrence, fully unrolled (T is small & static):
            # one (Bp,H)x(H,4H) MXU push per step.
            for t in range(T):
                g = gx[t * Bp:(t + 1) * Bp, :] + jnp.dot(
                    h, whh_ref[...], preferred_element_type=jnp.float32)
                h, c = cell(g, c)
                if l < num_layers - 1:
                    # Keep the hidden sequence in VMEM for the next layer;
                    # never written back to HBM.
                    hseq_sc[t * Bp:(t + 1) * Bp, :] = h

            if l < num_layers - 1:
                seq = hseq_sc[...]            # (T*Bp, H) next layer's input

        # Fused FC head on the final hidden state (dropout = identity in eval).
        out_ref[...] = (
            jnp.dot(h, wfc_ref[...], preferred_element_type=jnp.float32)
            + bfc_ref[...]
        ).astype(out_ref.dtype)

    return kernel


# ----------------------------------------------------------------------------
# Model wrapper (glue in plain JAX)
# ----------------------------------------------------------------------------
def init_params(key, input_size, hidden_size, num_layers, output_size):
    """PyTorch-style uniform(-1/sqrt(H), 1/sqrt(H)) init, deterministic."""
    bound = 1.0 / math.sqrt(hidden_size)
    layers = []
    d_in = input_size
    for _ in range(num_layers):
        key, k1, k2, k3, k4 = jax.random.split(key, 5)
        w_ih = jax.random.uniform(k1, (4 * hidden_size, d_in), jnp.float32, -bound, bound)
        w_hh = jax.random.uniform(k2, (4 * hidden_size, hidden_size), jnp.float32, -bound, bound)
        b_ih = jax.random.uniform(k3, (4 * hidden_size,), jnp.float32, -bound, bound)
        b_hh = jax.random.uniform(k4, (4 * hidden_size,), jnp.float32, -bound, bound)
        layers.append({
            "w_ihT": w_ih.T,                                   # (D_in, 4H)
            "w_hhT": w_hh.T,                                   # (H, 4H)
            "b": (b_ih + b_hh).reshape(1, 4 * hidden_size),    # (1, 4H)
        })
        d_in = hidden_size
    key, k5, k6 = jax.random.split(key, 3)
    fc_bound = 1.0 / math.sqrt(hidden_size)
    w_fc = jax.random.uniform(k5, (output_size, hidden_size), jnp.float32, -fc_bound, fc_bound)
    b_fc = jax.random.uniform(k6, (output_size,), jnp.float32, -fc_bound, fc_bound)
    return {"lstm": layers, "fc_wT": w_fc.T, "fc_b": b_fc.reshape(1, output_size)}


@jax.jit
def lstm_model_forward(x, params):
    """x: (B, T, input_size) batch_first, returns (B, output_size)."""
    B, T, I = x.shape
    layers = params["lstm"]
    num_layers = len(layers)
    H = layers[0]["w_hhT"].shape[0]
    O = params["fc_wT"].shape[1]

    # Pad batch to a multiple of 8 (f32 sublanes) and flatten to time-major rows
    # so row offsets t*Bp are always 8-aligned inside the kernel.
    Bp = _round_up(B, 8)
    x_tm = jnp.transpose(x, (1, 0, 2))                   # (T, B, I)
    if Bp != B:
        x_tm = jnp.pad(x_tm, ((0, 0), (0, Bp - B), (0, 0)))
    x_flat = x_tm.reshape(T * Bp, I)                     # (T*Bp, I)

    args = [x_flat]
    for layer in layers:
        args += [layer["w_ihT"], layer["w_hhT"], layer["b"]]
    args += [params["fc_wT"], params["fc_b"]]

    scratch_shapes = []
    if num_layers > 1:
        # Intermediate hidden sequence stays in VMEM (never written to HBM).
        scratch_shapes = [pltpu.VMEM((T * Bp, H), jnp.float32)]

    y_pad = pl.pallas_call(
        make_fused_lstm_kernel(num_layers, T, Bp, H),
        out_shape=jax.ShapeDtypeStruct((Bp, O), x.dtype),
        scratch_shapes=scratch_shapes,
    )(*args)
    return y_pad[:B]


# ----------------------------------------------------------------------------
# Pure-JAX reference (same math) for a sanity check.
# ----------------------------------------------------------------------------
def reference_forward(x, params):
    h_seq = jnp.transpose(x, (1, 0, 2))
    for layer in params["lstm"]:
        T, B, _ = h_seq.shape
        H = layer["w_hhT"].shape[0]
        h = jnp.zeros((B, H), jnp.float32)
        c = jnp.zeros((B, H), jnp.float32)
        outs = []
        for t in range(T):
            gates = h_seq[t] @ layer["w_ihT"] + h @ layer["w_hhT"] + layer["b"]
            i_g = jax.nn.sigmoid(gates[:, 0 * H:1 * H])
            f_g = jax.nn.sigmoid(gates[:, 1 * H:2 * H])
            g_g = jnp.tanh(gates[:, 2 * H:3 * H])
            o_g = jax.nn.sigmoid(gates[:, 3 * H:4 * H])
            c = f_g * c + i_g * g_g
            h = o_g * jnp.tanh(c)
            outs.append(h)
        h_seq = jnp.stack(outs, axis=0)
    return h_seq[-1] @ params["fc_wT"] + params["fc_b"]


if __name__ == "__main__":
    # Small shapes consistent with the module: (batch, seq_len, input_size)
    B, T, INPUT, HIDDEN, LAYERS, OUTPUT = 2, 8, 4, 32, 2, 1

    key = jax.random.PRNGKey(0)
    kx, kp = jax.random.split(key)
    x = jax.random.normal(kx, (B, T, INPUT), jnp.float32)
    params = init_params(kp, INPUT, HIDDEN, LAYERS, OUTPUT)

    y = lstm_model_forward(x, params)
    y = jax.block_until_ready(y)

    y_ref = reference_forward(x, params)
    assert y.shape == (B, OUTPUT)
    assert jnp.allclose(y, y_ref, atol=1e-4, rtol=1e-4), "mismatch vs reference"

    print("KERNEL_OK")
</pallas_src>

<mosaic_0001>
module attributes {stable_mosaic.version = 11 : i64} {
  func.func @kernel(%arg0: memref<64x4xf32, #tpu.memory_space<vmem>>, %arg1: memref<4x128xf32, #tpu.memory_space<vmem>>, %arg2: memref<32x128xf32, #tpu.memory_space<vmem>>, %arg3: memref<1x128xf32, #tpu.memory_space<vmem>>, %arg4: memref<32x128xf32, #tpu.memory_space<vmem>>, %arg5: memref<32x128xf32, #tpu.memory_space<vmem>>, %arg6: memref<1x128xf32, #tpu.memory_space<vmem>>, %arg7: memref<32x1xf32, #tpu.memory_space<vmem>>, %arg8: memref<1x1xf32, #tpu.memory_space<vmem>>, %arg9: memref<8x1xf32, #tpu.memory_space<vmem>>, %arg10: memref<64x32xf32, #tpu.memory_space<vmem>>) attributes {dimension_semantics = [], scalar_prefetch = 0 : i64, scratch_operands = 1 : i64, tpu.core_type = #tpu.core_type<tc>} {
    %c0 = arith.constant 0 : index
    %c0_0 = arith.constant 0 : index
    %0 = vector.load %arg0[%c0, %c0_0] : memref<64x4xf32, #tpu.memory_space<vmem>>, vector<64x4xf32>
    %c0_1 = arith.constant 0 : index
    %c0_2 = arith.constant 0 : index
    %1 = vector.load %arg1[%c0_1, %c0_2] : memref<4x128xf32, #tpu.memory_space<vmem>>, vector<4x128xf32>
    %cst = arith.constant dense<0.000000e+00> : vector<64x128xf32>
    %2 = tpu.matmul %0, %1, %cst {dimension_numbers = #tpu.dot_dimension_numbers<[1], [0], [0], [1], [0, 0, 1, 1], [], []>} : vector<64x4xf32>, vector<4x128xf32>, vector<64x128xf32> -> vector<64x128xf32>
    %c0_3 = arith.constant 0 : index
    %c0_4 = arith.constant 0 : index
    %3 = vector.load %arg3[%c0_3, %c0_4] : memref<1x128xf32, #tpu.memory_space<vmem>>, vector<1x128xf32>
    %4 = vector.broadcast %3 : vector<1x128xf32> to vector<64x128xf32>
    %5 = arith.addf %2, %4 : vector<64x128xf32>
    %cst_5 = arith.constant 0.000000e+00 : f32
    %6 = vector.broadcast %cst_5 : f32 to vector<8x32xf32>
    %cst_6 = arith.constant 0.000000e+00 : f32
    %7 = vector.broadcast %cst_6 : f32 to vector<8x32xf32>
    %8 = vector.extract_strided_slice %5 {offsets = [0, 0], sizes = [8, 128], strides = [1, 1]} : vector<64x128xf32> to vector<8x128xf32>
    %c0_7 = arith.constant 0 : index
    %c0_8 = arith.constant 0 : index
    %9 = vector.load %arg2[%c0_7, %c0_8] : memref<32x128xf32, #tpu.memory_space<vmem>>, vector<32x128xf32>
    %cst_9 = arith.constant dense<0.000000e+00> : vector<8x128xf32>
    %10 = tpu.matmul %6, %9, %cst_9 {dimension_numbers = #tpu.dot_dimension_numbers<[1], [0], [0], [1], [0, 0, 1, 1], [], []>} : vector<8x32xf32>, vector<32x128xf32>, vector<8x128xf32> -> vector<8x128xf32>
    %11 = arith.addf %8, %10 : vector<8x128xf32>
    %12 = vector.extract_strided_slice %11 {offsets = [0, 0], sizes = [8, 32], strides = [1, 1]} : vector<8x128xf32> to vector<8x32xf32>
    %13 = arith.negf %12 : vector<8x32xf32>
    %14 = math.exp %13 : vector<8x32xf32>
    %cst_10 = arith.constant 1.000000e+00 : f32
    %15 = vector.broadcast %cst_10 : f32 to vector<8x32xf32>
    %16 = arith.addf %15, %14 : vector<8x32xf32>
    %17 = arith.divf %15, %16 : vector<8x32xf32>
    %18 = vector.extract_strided_slice %11 {offsets = [0, 32], sizes = [8, 32], strides = [1, 1]} : vector<8x128xf32> to vector<8x32xf32>
    %19 = arith.negf %18 : vector<8x32xf32>
    %20 = math.exp %19 : vector<8x32xf32>
    %cst_11 = arith.constant 1.000000e+00 : f32
    %21 = vector.broadcast %cst_11 : f32 to vector<8x32xf32>
    %22 = arith.addf %21, %20 : vector<8x32xf32>
    %23 = arith.divf %21, %22 : vector<8x32xf32>
    %24 = vector.extract_strided_slice %11 {offsets = [0, 64], sizes = [8, 32], strides = [1, 1]} : vector<8x128xf32> to vector<8x32xf32>
    %25 = math.tanh %24 : vector<8x32xf32>
    %26 = vector.extract_strided_slice %11 {offsets = [0, 96], sizes = [8, 32], strides = [1, 1]} : vector<8x128xf32> to vector<8x32xf32>
    %27 = arith.negf %26 : vector<8x32xf32>
    %28 = math.exp %27 : vector<8x32xf32>
    %cst_12 = arith.constant 1.000000e+00 : f32
    %29 = vector.broadcast %cst_12 : f32 to vector<8x32xf32>
    %30 = arith.addf %29, %28 : vector<8x32xf32>
    %31 = arith.divf %29, %30 : vector<8x32xf32>
    %32 = arith.mulf %23, %7 : vector<8x32xf32>
    %33 = arith.mulf %17, %25 : vector<8x32xf32>
    %34 = arith.addf %32, %33 : vector<8x32xf32>
    %35 = math.tanh %34 : vector<8x32xf32>
    %36 = arith.mulf %31, %35 : vector<8x32xf32>
    %c0_13 = arith.constant 0 : index
    %c0_14 = arith.constant 0 : index
    %37 = vector.load %arg10[%c0_13, %c0_14] : memref<64x32xf32, #tpu.memory_space<vmem>>, vector<8x32xf32>
    tpu.vector_store %arg10[%c0_13, %c0_14], %36 {strides = array<i32>} : memref<64x32xf32, #tpu.memory_space<vmem>>, vector<8x32xf32>,
    %38 = vector.extract_strided_slice %5 {offsets = [8, 0], sizes = [8, 128], strides = [1, 1]} : vector<64x128xf32> to vector<8x128xf32>
    %c0_15 = arith.constant 0 : index
    %c0_16 = arith.constant 0 : index
    %39 = vector.load %arg2[%c0_15, %c0_16] : memref<32x128xf32, #tpu.memory_space<vmem>>, vector<32x128xf32>
    %cst_17 = arith.constant dense<0.000000e+00> : vector<8x128xf32>
    %40 = tpu.matmul %36, %39, %cst_17 {dimension_numbers = #tpu.dot_dimension_numbers<[1], [0], [0], [1], [0, 0, 1, 1], [], []>} : vector<8x32xf32>, vector<32x128xf32>, vector<8x128xf32> -> vector<8x128xf32>
    %41 = arith.addf %38, %40 : vector<8x128xf32>
    %42 = vector.extract_strided_slice %41 {offsets = [0, 0], sizes = [8, 32], strides = [1, 1]} : vector<8x128xf32> to vector<8x32xf32>
    %43 = arith.negf %42 : vector<8x32xf32>
    %44 = math.exp %43 : vector<8x32xf32>
    %cst_18 = arith.constant 1.000000e+00 : f32
    %45 = vector.broadcast %cst_18 : f32 to vector<8x32xf32>
    %46 = arith.addf %45, %44 : vector<8x32xf32>
    %47 = arith.divf %45, %46 : vector<8x32xf32>
    %48 = vector.extract_strided_slice %41 {offsets = [0, 32], sizes = [8, 32], strides = [1, 1]} : vector<8x128xf32> to vector<8x32xf32>
    %49 = arith.negf %48 : vector<8x32xf32>
    %50 = math.exp %49 : vector<8x32xf32>
    %cst_19 = arith.constant 1.000000e+00 : f32
    %51 = vector.broadcast %cst_19 : f32 to vector<8x32xf32>
    %52 = arith.addf %51, %50 : vector<8x32xf32>
    %53 = arith.divf %51, %52 : vector<8x32xf32>
    %54 = vector.extract_strided_slice %41 {offsets = [0, 64], sizes = [8, 32], strides = [1, 1]} : vector<8x128xf32> to vector<8x32xf32>
    %55 = math.tanh %54 : vector<8x32xf32>
    %56 = vector.extract_strided_slice %41 {offsets = [0, 96], sizes = [8, 32], strides = [1, 1]} : vector<8x128xf32> to vector<8x32xf32>
    %57 = arith.negf %56 : vector<8x32xf32>
    %58 = math.exp %57 : vector<8x32xf32>
    %cst_20 = arith.constant 1.000000e+00 : f32
    %59 = vector.broadcast %cst_20 : f32 to vector<8x32xf32>
    %60 = arith.addf %59, %58 : vector<8x32xf32>
    %61 = arith.divf %59, %60 : vector<8x32xf32>
    %62 = arith.mulf %53, %34 : vector<8x32xf32>
    %63 = arith.mulf %47, %55 : vector<8x32xf32>
    %64 = arith.addf %62, %63 : vector<8x32xf32>
    %65 = math.tanh %64 : vector<8x32xf32>
    %66 = arith.mulf %61, %65 : vector<8x32xf32>
    %c8 = arith.constant 8 : index
    %c0_21 = arith.constant 0 : index
    %67 = vector.load %arg10[%c8, %c0_21] : memref<64x32xf32, #tpu.memory_space<vmem>>, vector<8x32xf32>
    tpu.vector_store %arg10[%c8, %c0_21], %66 {strides = array<i32>} : memref<64x32xf32, #tpu.memory_space<vmem>>, vector<8x32xf32>,
    %68 = vector.extract_strided_slice %5 {offsets = [16, 0], sizes = [8, 128], strides = [1, 1]} : vector<64x128xf32> to vector<8x128xf32>
    %c0_22 = arith.constant 0 : index
    %c0_23 = arith.constant 0 : index
    %69 = vector.load %arg2[%c0_22, %c0_23] : memref<32x128xf32, #tpu.memory_space<vmem>>, vector<32x128xf32>
    %cst_24 = arith.constant dense<0.000000e+00> : vector<8x128xf32>
    %70 = tpu.matmul %66, %69, %cst_24 {dimension_numbers = #tpu.dot_dimension_numbers<[1], [0], [0], [1], [0, 0, 1, 1], [], []>} : vector<8x32xf32>, vector<32x128xf32>, vector<8x128xf32> -> vector<8x128xf32>
    %71 = arith.addf %68, %70 : vector<8x128xf32>
    %72 = vector.extract_strided_slice %71 {offsets = [0, 0], sizes = [8, 32], strides = [1, 1]} : vector<8x128xf32> to vector<8x32xf32>
    %73 = arith.negf %72 : vector<8x32xf32>
    %74 = math.exp %73 : vector<8x32xf32>
    %cst_25 = arith.constant 1.000000e+00 : f32
    %75 = vector.broadcast %cst_25 : f32 to vector<8x32xf32>
    %76 = arith.addf %75, %74 : vector<8x32xf32>
    %77 = arith.divf %75, %76 : vector<8x32xf32>
    %78 = vector.extract_strided_slice %71 {offsets = [0, 32], sizes = [8, 32], strides = [1, 1]} : vector<8x128xf32> to vector<8x32xf32>
    %79 = arith.negf %78 : vector<8x32xf32>
    %80 = math.exp %79 : vector<8x32xf32>
    %cst_26 = arith.constant 1.000000e+00 : f32
    %81 = vector.broadcast %cst_26 : f32 to vector<8x32xf32>
    %82 = arith.addf %81, %80 : vector<8x32xf32>
    %83 = arith.divf %81, %82 : vector<8x32xf32>
    %84 = vector.extract_strided_slice %71 {offsets = [0, 64], sizes = [8, 32], strides = [1, 1]} : vector<8x128xf32> to vector<8x32xf32>
    %85 = math.tanh %84 : vector<8x32xf32>
    %86 = vector.extract_strided_slice %71 {offsets = [0, 96], sizes = [8, 32], strides = [1, 1]} : vector<8x128xf32> to vector<8x32xf32>
    %87 = arith.negf %86 : vector<8x32xf32>
    %88 = math.exp %87 : vector<8x32xf32>
    %cst_27 = arith.constant 1.000000e+00 : f32
    %89 = vector.broadcast %cst_27 : f32 to vector<8x32xf32>
    %90 = arith.addf %89, %88 : vector<8x32xf32>
    %91 = arith.divf %89, %90 : vector<8x32xf32>
    %92 = arith.mulf %83, %64 : vector<8x32xf32>
    %93 = arith.mulf %77, %85 : vector<8x32xf32>
    %94 = arith.addf %92, %93 : vector<8x32xf32>
    %95 = math.tanh %94 : vector<8x32xf32>
    %96 = arith.mulf %91, %95 : vector<8x32xf32>
    %c16 = arith.constant 16 : index
    %c0_28 = arith.constant 0 : index
    %97 = vector.load %arg10[%c16, %c0_28] : memref<64x32xf32, #tpu.memory_space<vmem>>, vector<8x32xf32>
    tpu.vector_store %arg10[%c16, %c0_28], %96 {strides = array<i32>} : memref<64x32xf32, #tpu.memory_space<vmem>>, vector<8x32xf32>,
    %98 = vector.extract_strided_slice %5 {offsets = [24, 0], sizes = [8, 128], strides = [1, 1]} : vector<64x128xf32> to vector<8x128xf32>
    %c0_29 = arith.constant 0 : index
    %c0_30 = arith.constant 0 : index
    %99 = vector.load %arg2[%c0_29, %c0_30] : memref<32x128xf32, #tpu.memory_space<vmem>>, vector<32x128xf32>
    %cst_31 = arith.constant dense<0.000000e+00> : vector<8x128xf32>
    %100 = tpu.matmul %96, %99, %cst_31 {dimension_numbers = #tpu.dot_dimension_numbers<[1], [0], [0], [1], [0, 0, 1, 1], [], []>} : vector<8x32xf32>, vector<32x128xf32>, vector<8x128xf32> -> vector<8x128xf32>
    %101 = arith.addf %98, %100 : vector<8x128xf32>
    %102 = vector.extract_strided_slice %101 {offsets = [0, 0], sizes = [8, 32], strides = [1, 1]} : vector<8x128xf32> to vector<8x32xf32>
    %103 = arith.negf %102 : vector<8x32xf32>
    %104 = math.exp %103 : vector<8x32xf32>
    %cst_32 = arith.constant 1.000000e+00 : f32
    %105 = vector.broadcast %cst_32 : f32 to vector<8x32xf32>
    %106 = arith.addf %105, %104 : vector<8x32xf32>
    %107 = arith.divf %105, %106 : vector<8x32xf32>
    %108 = vector.extract_strided_slice %101 {offsets = [0, 32], sizes = [8, 32], strides = [1, 1]} : vector<8x128xf32> to vector<8x32xf32>
    %109 = arith.negf %108 : vector<8x32xf32>
    %110 = math.exp %109 : vector<8x32xf32>
    %cst_33 = arith.constant 1.000000e+00 : f32
    %111 = vector.broadcast %cst_33 : f32 to vector<8x32xf32>
    %112 = arith.addf %111, %110 : vector<8x32xf32>
    %113 = arith.divf %111, %112 : vector<8x32xf32>
    %114 = vector.extract_strided_slice %101 {offsets = [0, 64], sizes = [8, 32], strides = [1, 1]} : vector<8x128xf32> to vector<8x32xf32>
    %115 = math.tanh %114 : vector<8x32xf32>
    %116 = vector.extract_strided_slice %101 {offsets = [0, 96], sizes = [8, 32], strides = [1, 1]} : vector<8x128xf32> to vector<8x32xf32>
    %117 = arith.negf %116 : vector<8x32xf32>
    %118 = math.exp %117 : vector<8x32xf32>
    %cst_34 = arith.constant 1.000000e+00 : f32
    %119 = vector.broadcast %cst_34 : f32 to vector<8x32xf32>
    %120 = arith.addf %119, %118 : vector<8x32xf32>
    %121 = arith.divf %119, %120 : vector<8x32xf32>
    %122 = arith.mulf %113, %94 : vector<8x32xf32>
    %123 = arith.mulf %107, %115 : vector<8x32xf32>
    %124 = arith.addf %122, %123 : vector<8x32xf32>
    %125 = math.tanh %124 : vector<8x32xf32>
    %126 = arith.mulf %121, %125 : vector<8x32xf32>
    %c24 = arith.constant 24 : index
    %c0_35 = arith.constant 0 : index
    %127 = vector.load %arg10[%c24, %c0_35] : memref<64x32xf32, #tpu.memory_space<vmem>>, vector<8x32xf32>
    tpu.vector_store %arg10[%c24, %c0_35], %126 {strides = array<i32>} : memref<64x32xf32, #tpu.memory_space<vmem>>, vector<8x32xf32>,
    %128 = vector.extract_strided_slice %5 {offsets = [32, 0], sizes = [8, 128], strides = [1, 1]} : vector<64x128xf32> to vector<8x128xf32>
    %c0_36 = arith.constant 0 : index
    %c0_37 = arith.constant 0 : index
    %129 = vector.load %arg2[%c0_36, %c0_37] : memref<32x128xf32, #tpu.memory_space<vmem>>, vector<32x128xf32>
    %cst_38 = arith.constant dense<0.000000e+00> : vector<8x128xf32>
    %130 = tpu.matmul %126, %129, %cst_38 {dimension_numbers = #tpu.dot_dimension_numbers<[1], [0], [0], [1], [0, 0, 1, 1], [], []>} : vector<8x32xf32>, vector<32x128xf32>, vector<8x128xf32> -> vector<8x128xf32>
    %131 = arith.addf %128, %130 : vector<8x128xf32>
    %132 = vector.extract_strided_slice %131 {offsets = [0, 0], sizes = [8, 32], strides = [1, 1]} : vector<8x128xf32> to vector<8x32xf32>
    %133 = arith.negf %132 : vector<8x32xf32>
    %134 = math.exp %133 : vector<8x32xf32>
    %cst_39 = arith.constant 1.000000e+00 : f32
    %135 = vector.broadcast %cst_39 : f32 to vector<8x32xf32>
    %136 = arith.addf %135, %134 : vector<8x32xf32>
    %137 = arith.divf %135, %136 : vector<8x32xf32>
    %138 = vector.extract_strided_slice %131 {offsets = [0, 32], sizes = [8, 32], strides = [1, 1]} : vector<8x128xf32> to vector<8x32xf32>
    %139 = arith.negf %138 : vector<8x32xf32>
    %140 = math.exp %139 : vector<8x32xf32>
    %cst_40 = arith.constant 1.000000e+00 : f32
    %141 = vector.broadcast %cst_40 : f32 to vector<8x32xf32>
    %142 = arith.addf %141, %140 : vector<8x32xf32>
    %143 = arith.divf %141, %142 : vector<8x32xf32>
    %144 = vector.extract_strided_slice %131 {offsets = [0, 64], sizes = [8, 32], strides = [1, 1]} : vector<8x128xf32> to vector<8x32xf32>
    %145 = math.tanh %144 : vector<8x32xf32>
    %146 = vector.extract_strided_slice %131 {offsets = [0, 96], sizes = [8, 32], strides = [1, 1]} : vector<8x128xf32> to vector<8x32xf32>
    %147 = arith.negf %146 : vector<8x32xf32>
    %148 = math.exp %147 : vector<8x32xf32>
    %cst_41 = arith.constant 1.000000e+00 : f32
    %149 = vector.broadcast %cst_41 : f32 to vector<8x32xf32>
    %150 = arith.addf %149, %148 : vector<8x32xf32>
    %151 = arith.divf %149, %150 : vector<8x32xf32>
    %152 = arith.mulf %143, %124 : vector<8x32xf32>
    %153 = arith.mulf %137, %145 : vector<8x32xf32>
    %154 = arith.addf %152, %153 : vector<8x32xf32>
    %155 = math.tanh %154 : vector<8x32xf32>
    %156 = arith.mulf %151, %155 : vector<8x32xf32>
    %c32 = arith.constant 32 : index
    %c0_42 = arith.constant 0 : index
    %157 = vector.load %arg10[%c32, %c0_42] : memref<64x32xf32, #tpu.memory_space<vmem>>, vector<8x32xf32>
    tpu.vector_store %arg10[%c32, %c0_42], %156 {strides = array<i32>} : memref<64x32xf32, #tpu.memory_space<vmem>>, vector<8x32xf32>,
    %158 = vector.extract_strided_slice %5 {offsets = [40, 0], sizes = [8, 128], strides = [1, 1]} : vector<64x128xf32> to vector<8x128xf32>
    %c0_43 = arith.constant 0 : index
    %c0_44 = arith.constant 0 : index
    %159 = vector.load %arg2[%c0_43, %c0_44] : memref<32x128xf32, #tpu.memory_space<vmem>>, vector<32x128xf32>
    %cst_45 = arith.constant dense<0.000000e+00> : vector<8x128xf32>
    %160 = tpu.matmul %156, %159, %cst_45 {dimension_numbers = #tpu.dot_dimension_numbers<[1], [0], [0], [1], [0, 0, 1, 1], [], []>} : vector<8x32xf32>, vector<32x128xf32>, vector<8x128xf32> -> vector<8x128xf32>
    %161 = arith.addf %158, %160 : vector<8x128xf32>
    %162 = vector.extract_strided_slice %161 {offsets = [0, 0], sizes = [8, 32], strides = [1, 1]} : vector<8x128xf32> to vector<8x32xf32>
    %163 = arith.negf %162 : vector<8x32xf32>
    %164 = math.exp %163 : vector<8x32xf32>
    %cst_46 = arith.constant 1.000000e+00 : f32
    %165 = vector.broadcast %cst_46 : f32 to vector<8x32xf32>
    %166 = arith.addf %165, %164 : vector<8x32xf32>
    %167 = arith.divf %165, %166 : vector<8x32xf32>
    %168 = vector.extract_strided_slice %161 {offsets = [0, 32], sizes = [8, 32], strides = [1, 1]} : vector<8x128xf32> to vector<8x32xf32>
    %169 = arith.negf %168 : vector<8x32xf32>
    %170 = math.exp %169 : vector<8x32xf32>
    %cst_47 = arith.constant 1.000000e+00 : f32
    %171 = vector.broadcast %cst_47 : f32 to vector<8x32xf32>
    %172 = arith.addf %171, %170 : vector<8x32xf32>
    %173 = arith.divf %171, %172 : vector<8x32xf32>
    %174 = vector.extract_strided_slice %161 {offsets = [0, 64], sizes = [8, 32], strides = [1, 1]} : vector<8x128xf32> to vector<8x32xf32>
    %175 = math.tanh %174 : vector<8x32xf32>
    %176 = vector.extract_strided_slice %161 {offsets = [0, 96], sizes = [8, 32], strides = [1, 1]} : vector<8x128xf32> to vector<8x32xf32>
    %177 = arith.negf %176 : vector<8x32xf32>
    %178 = math.exp %177 : vector<8x32xf32>
    %cst_48 = arith.constant 1.000000e+00 : f32
    %179 = vector.broadcast %cst_48 : f32 to vector<8x32xf32>
    %180 = arith.addf %179, %178 : vector<8x32xf32>
    %181 = arith.divf %179, %180 : vector<8x32xf32>
    %182 = arith.mulf %173, %154 : vector<8x32xf32>
    %183 = arith.mulf %167, %175 : vector<8x32xf32>
    %184 = arith.addf %182, %183 : vector<8x32xf32>
    %185 = math.tanh %184 : vector<8x32xf32>
    %186 = arith.mulf %181, %185 : vector<8x32xf32>
    %c40 = arith.constant 40 : index
    %c0_49 = arith.constant 0 : index
    %187 = vector.load %arg10[%c40, %c0_49] : memref<64x32xf32, #tpu.memory_space<vmem>>, vector<8x32xf32>
    tpu.vector_store %arg10[%c40, %c0_49], %186 {strides = array<i32>} : memref<64x32xf32, #tpu.memory_space<vmem>>, vector<8x32xf32>,
    %188 = vector.extract_strided_slice %5 {offsets = [48, 0], sizes = [8, 128], strides = [1, 1]} : vector<64x128xf32> to vector<8x128xf32>
    %c0_50 = arith.constant 0 : index
    %c0_51 = arith.constant 0 : index
    %189 = vector.load %arg2[%c0_50, %c0_51] : memref<32x128xf32, #tpu.memory_space<vmem>>, vector<32x128xf32>
    %cst_52 = arith.constant dense<0.000000e+00> : vector<8x128xf32>
    %190 = tpu.matmul %186, %189, %cst_52 {dimension_numbers = #tpu.dot_dimension_numbers<[1], [0], [0], [1], [0, 0, 1, 1], [], []>} : vector<8x32xf32>, vector<32x128xf32>, vector<8x128xf32> -> vector<8x128xf32>
    %191 = arith.addf %188, %190 : vector<8x128xf32>
    %192 = vector.extract_strided_slice %191 {offsets = [0, 0], sizes = [8, 32], strides = [1, 1]} : vector<8x128xf32> to vector<8x32xf32>
    %193 = arith.negf %192 : vector<8x32xf32>
    %194 = math.exp %193 : vector<8x32xf32>
    %cst_53 = arith.constant 1.000000e+00 : f32
    %195 = vector.broadcast %cst_53 : f32 to vector<8x32xf32>
    %196 = arith.addf %195, %194 : vector<8x32xf32>
    %197 = arith.divf %195, %196 : vector<8x32xf32>
    %198 = vector.extract_strided_slice %191 {offsets = [0, 32], sizes = [8, 32], strides = [1, 1]} : vector<8x128xf32> to vector<8x32xf32>
    %199 = arith.negf %198 : vector<8x32xf32>
    %200 = math.exp %199 : vector<8x32xf32>
    %cst_54 = arith.constant 1.000000e+00 : f32
    %201 = vector.broadcast %cst_54 : f32 to vector<8x32xf32>
    %202 = arith.addf %201, %200 : vector<8x32xf32>
    %203 = arith.divf %201, %202 : vector<8x32xf32>
    %204 = vector.extract_strided_slice %191 {offsets = [0, 64], sizes = [8, 32], strides = [1, 1]} : vector<8x128xf32> to vector<8x32xf32>
    %205 = math.tanh %204 : vector<8x32xf32>
    %206 = vector.extract_strided_slice %191 {offsets = [0, 96], sizes = [8, 32], strides = [1, 1]} : vector<8x128xf32> to vector<8x32xf32>
    %207 = arith.negf %206 : vector<8x32xf32>
    %208 = math.exp %207 : vector<8x32xf32>
    %cst_55 = arith.constant 1.000000e+00 : f32
    %209 = vector.broadcast %cst_55 : f32 to vector<8x32xf32>
    %210 = arith.addf %209, %208 : vector<8x32xf32>
    %211 = arith.divf %209, %210 : vector<8x32xf32>
    %212 = arith.mulf %203, %184 : vector<8x32xf32>
    %213 = arith.mulf %197, %205 : vector<8x32xf32>
    %214 = arith.addf %212, %213 : vector<8x32xf32>
    %215 = math.tanh %214 : vector<8x32xf32>
    %216 = arith.mulf %211, %215 : vector<8x32xf32>
    %c48 = arith.constant 48 : index
    %c0_56 = arith.constant 0 : index
    %217 = vector.load %arg10[%c48, %c0_56] : memref<64x32xf32, #tpu.memory_space<vmem>>, vector<8x32xf32>
    tpu.vector_store %arg10[%c48, %c0_56], %216 {strides = array<i32>} : memref<64x32xf32, #tpu.memory_space<vmem>>, vector<8x32xf32>,
    %218 = vector.extract_strided_slice %5 {offsets = [56, 0], sizes = [8, 128], strides = [1, 1]} : vector<64x128xf32> to vector<8x128xf32>
    %c0_57 = arith.constant 0 : index
    %c0_58 = arith.constant 0 : index
    %219 = vector.load %arg2[%c0_57, %c0_58] : memref<32x128xf32, #tpu.memory_space<vmem>>, vector<32x128xf32>
    %cst_59 = arith.constant dense<0.000000e+00> : vector<8x128xf32>
    %220 = tpu.matmul %216, %219, %cst_59 {dimension_numbers = #tpu.dot_dimension_numbers<[1], [0], [0], [1], [0, 0, 1, 1], [], []>} : vector<8x32xf32>, vector<32x128xf32>, vector<8x128xf32> -> vector<8x128xf32>
    %221 = arith.addf %218, %220 : vector<8x128xf32>
    %222 = vector.extract_strided_slice %221 {offsets = [0, 0], sizes = [8, 32], strides = [1, 1]} : vector<8x128xf32> to vector<8x32xf32>
    %223 = arith.negf %222 : vector<8x32xf32>
    %224 = math.exp %223 : vector<8x32xf32>
    %cst_60 = arith.constant 1.000000e+00 : f32
    %225 = vector.broadcast %cst_60 : f32 to vector<8x32xf32>
    %226 = arith.addf %225, %224 : vector<8x32xf32>
    %227 = arith.divf %225, %226 : vector<8x32xf32>
    %228 = vector.extract_strided_slice %221 {offsets = [0, 32], sizes = [8, 32], strides = [1, 1]} : vector<8x128xf32> to vector<8x32xf32>
    %229 = arith.negf %228 : vector<8x32xf32>
    %230 = math.exp %229 : vector<8x32xf32>
    %cst_61 = arith.constant 1.000000e+00 : f32
    %231 = vector.broadcast %cst_61 : f32 to vector<8x32xf32>
    %232 = arith.addf %231, %230 : vector<8x32xf32>
    %233 = arith.divf %231, %232 : vector<8x32xf32>
    %234 = vector.extract_strided_slice %221 {offsets = [0, 64], sizes = [8, 32], strides = [1, 1]} : vector<8x128xf32> to vector<8x32xf32>
    %235 = math.tanh %234 : vector<8x32xf32>
    %236 = vector.extract_strided_slice %221 {offsets = [0, 96], sizes = [8, 32], strides = [1, 1]} : vector<8x128xf32> to vector<8x32xf32>
    %237 = arith.negf %236 : vector<8x32xf32>
    %238 = math.exp %237 : vector<8x32xf32>
    %cst_62 = arith.constant 1.000000e+00 : f32
    %239 = vector.broadcast %cst_62 : f32 to vector<8x32xf32>
    %240 = arith.addf %239, %238 : vector<8x32xf32>
    %241 = arith.divf %239, %240 : vector<8x32xf32>
    %242 = arith.mulf %233, %214 : vector<8x32xf32>
    %243 = arith.mulf %227, %235 : vector<8x32xf32>
    %244 = arith.addf %242, %243 : vector<8x32xf32>
    %245 = math.tanh %244 : vector<8x32xf32>
    %246 = arith.mulf %241, %245 : vector<8x32xf32>
    %c56 = arith.constant 56 : index
    %c0_63 = arith.constant 0 : index
    %247 = vector.load %arg10[%c56, %c0_63] : memref<64x32xf32, #tpu.memory_space<vmem>>, vector<8x32xf32>
    tpu.vector_store %arg10[%c56, %c0_63], %246 {strides = array<i32>} : memref<64x32xf32, #tpu.memory_space<vmem>>, vector<8x32xf32>,
    %c0_64 = arith.constant 0 : index
    %c0_65 = arith.constant 0 : index
    %248 = vector.load %arg10[%c0_64, %c0_65] : memref<64x32xf32, #tpu.memory_space<vmem>>, vector<64x32xf32>
    %c0_66 = arith.constant 0 : index
    %c0_67 = arith.constant 0 : index
    %249 = vector.load %arg4[%c0_66, %c0_67] : memref<32x128xf32, #tpu.memory_space<vmem>>, vector<32x128xf32>
    %cst_68 = arith.constant dense<0.000000e+00> : vector<64x128xf32>
    %250 = tpu.matmul %248, %249, %cst_68 {dimension_numbers = #tpu.dot_dimension_numbers<[1], [0], [0], [1], [0, 0, 1, 1], [], []>} : vector<64x32xf32>, vector<32x128xf32>, vector<64x128xf32> -> vector<64x128xf32>
    %c0_69 = arith.constant 0 : index
    %c0_70 = arith.constant 0 : index
    %251 = vector.load %arg6[%c0_69, %c0_70] : memref<1x128xf32, #tpu.memory_space<vmem>>, vector<1x128xf32>
    %252 = vector.broadcast %251 : vector<1x128xf32> to vector<64x128xf32>
    %253 = arith.addf %250, %252 : vector<64x128xf32>
    %cst_71 = arith.constant 0.000000e+00 : f32
    %254 = vector.broadcast %cst_71 : f32 to vector<8x32xf32>
    %cst_72 = arith.constant 0.000000e+00 : f32
    %255 = vector.broadcast %cst_72 : f32 to vector<8x32xf32>
    %256 = vector.extract_strided_slice %253 {offsets = [0, 0], sizes = [8, 128], strides = [1, 1]} : vector<64x128xf32> to vector<8x128xf32>
    %c0_73 = arith.constant 0 : index
    %c0_74 = arith.constant 0 : index
    %257 = vector.load %arg5[%c0_73, %c0_74] : memref<32x128xf32, #tpu.memory_space<vmem>>, vector<32x128xf32>
    %cst_75 = arith.constant dense<0.000000e+00> : vector<8x128xf32>
    %258 = tpu.matmul %254, %257, %cst_75 {dimension_numbers = #tpu.dot_dimension_numbers<[1], [0], [0], [1], [0, 0, 1, 1], [], []>} : vector<8x32xf32>, vector<32x128xf32>, vector<8x128xf32> -> vector<8x128xf32>
    %259 = arith.addf %256, %258 : vector<8x128xf32>
    %260 = vector.extract_strided_slice %259 {offsets = [0, 0], sizes = [8, 32], strides = [1, 1]} : vector<8x128xf32> to vector<8x32xf32>
    %261 = arith.negf %260 : vector<8x32xf32>
    %262 = math.exp %261 : vector<8x32xf32>
    %cst_76 = arith.constant 1.000000e+00 : f32
    %263 = vector.broadcast %cst_76 : f32 to vector<8x32xf32>
    %264 = arith.addf %263, %262 : vector<8x32xf32>
    %265 = arith.divf %263, %264 : vector<8x32xf32>
    %266 = vector.extract_strided_slice %259 {offsets = [0, 32], sizes = [8, 32], strides = [1, 1]} : vector<8x128xf32> to vector<8x32xf32>
    %267 = arith.negf %266 : vector<8x32xf32>
    %268 = math.exp %267 : vector<8x32xf32>
    %cst_77 = arith.constant 1.000000e+00 : f32
    %269 = vector.broadcast %cst_77 : f32 to vector<8x32xf32>
    %270 = arith.addf %269, %268 : vector<8x32xf32>
    %271 = arith.divf %269, %270 : vector<8x32xf32>
    %272 = vector.extract_strided_slice %259 {offsets = [0, 64], sizes = [8, 32], strides = [1, 1]} : vector<8x128xf32> to vector<8x32xf32>
    %273 = math.tanh %272 : vector<8x32xf32>
    %274 = vector.extract_strided_slice %259 {offsets = [0, 96], sizes = [8, 32], strides = [1, 1]} : vector<8x128xf32> to vector<8x32xf32>
    %275 = arith.negf %274 : vector<8x32xf32>
    %276 = math.exp %275 : vector<8x32xf32>
    %cst_78 = arith.constant 1.000000e+00 : f32
    %277 = vector.broadcast %cst_78 : f32 to vector<8x32xf32>
    %278 = arith.addf %277, %276 : vector<8x32xf32>
    %279 = arith.divf %277, %278 : vector<8x32xf32>
    %280 = arith.mulf %271, %255 : vector<8x32xf32>
    %281 = arith.mulf %265, %273 : vector<8x32xf32>
    %282 = arith.addf %280, %281 : vector<8x32xf32>
    %283 = math.tanh %282 : vector<8x32xf32>
    %284 = arith.mulf %279, %283 : vector<8x32xf32>
    %285 = vector.extract_strided_slice %253 {offsets = [8, 0], sizes = [8, 128], strides = [1, 1]} : vector<64x128xf32> to vector<8x128xf32>
    %c0_79 = arith.constant 0 : index
    %c0_80 = arith.constant 0 : index
    %286 = vector.load %arg5[%c0_79, %c0_80] : memref<32x128xf32, #tpu.memory_space<vmem>>, vector<32x128xf32>
    %cst_81 = arith.constant dense<0.000000e+00> : vector<8x128xf32>
    %287 = tpu.matmul %284, %286, %cst_81 {dimension_numbers = #tpu.dot_dimension_numbers<[1], [0], [0], [1], [0, 0, 1, 1], [], []>} : vector<8x32xf32>, vector<32x128xf32>, vector<8x128xf32> -> vector<8x128xf32>
    %288 = arith.addf %285, %287 : vector<8x128xf32>
    %289 = vector.extract_strided_slice %288 {offsets = [0, 0], sizes = [8, 32], strides = [1, 1]} : vector<8x128xf32> to vector<8x32xf32>
    %290 = arith.negf %289 : vector<8x32xf32>
    %291 = math.exp %290 : vector<8x32xf32>
    %cst_82 = arith.constant 1.000000e+00 : f32
    %292 = vector.broadcast %cst_82 : f32 to vector<8x32xf32>
    %293 = arith.addf %292, %291 : vector<8x32xf32>
    %294 = arith.divf %292, %293 : vector<8x32xf32>
    %295 = vector.extract_strided_slice %288 {offsets = [0, 32], sizes = [8, 32], strides = [1, 1]} : vector<8x128xf32> to vector<8x32xf32>
    %296 = arith.negf %295 : vector<8x32xf32>
    %297 = math.exp %296 : vector<8x32xf32>
    %cst_83 = arith.constant 1.000000e+00 : f32
    %298 = vector.broadcast %cst_83 : f32 to vector<8x32xf32>
    %299 = arith.addf %298, %297 : vector<8x32xf32>
    %300 = arith.divf %298, %299 : vector<8x32xf32>
    %301 = vector.extract_strided_slice %288 {offsets = [0, 64], sizes = [8, 32], strides = [1, 1]} : vector<8x128xf32> to vector<8x32xf32>
    %302 = math.tanh %301 : vector<8x32xf32>
    %303 = vector.extract_strided_slice %288 {offsets = [0, 96], sizes = [8, 32], strides = [1, 1]} : vector<8x128xf32> to vector<8x32xf32>
    %304 = arith.negf %303 : vector<8x32xf32>
    %305 = math.exp %304 : vector<8x32xf32>
    %cst_84 = arith.constant 1.000000e+00 : f32
    %306 = vector.broadcast %cst_84 : f32 to vector<8x32xf32>
    %307 = arith.addf %306, %305 : vector<8x32xf32>
    %308 = arith.divf %306, %307 : vector<8x32xf32>
    %309 = arith.mulf %300, %282 : vector<8x32xf32>
    %310 = arith.mulf %294, %302 : vector<8x32xf32>
    %311 = arith.addf %309, %310 : vector<8x32xf32>
    %312 = math.tanh %311 : vector<8x32xf32>
    %313 = arith.mulf %308, %312 : vector<8x32xf32>
    %314 = vector.extract_strided_slice %253 {offsets = [16, 0], sizes = [8, 128], strides = [1, 1]} : vector<64x128xf32> to vector<8x128xf32>
    %c0_85 = arith.constant 0 : index
    %c0_86 = arith.constant 0 : index
    %315 = vector.load %arg5[%c0_85, %c0_86] : memref<32x128xf32, #tpu.memory_space<vmem>>, vector<32x128xf32>
    %cst_87 = arith.constant dense<0.000000e+00> : vector<8x128xf32>
    %316 = tpu.matmul %313, %315, %cst_87 {dimension_numbers = #tpu.dot_dimension_numbers<[1], [0], [0], [1], [0, 0, 1, 1], [], []>} : vector<8x32xf32>, vector<32x128xf32>, vector<8x128xf32> -> vector<8x128xf32>
    %317 = arith.addf %314, %316 : vector<8x128xf32>
    %318 = vector.extract_strided_slice %317 {offsets = [0, 0], sizes = [8, 32], strides = [1, 1]} : vector<8x128xf32> to vector<8x32xf32>
    %319 = arith.negf %318 : vector<8x32xf32>
    %320 = math.exp %319 : vector<8x32xf32>
    %cst_88 = arith.constant 1.000000e+00 : f32
    %321 = vector.broadcast %cst_88 : f32 to vector<8x32xf32>
    %322 = arith.addf %321, %320 : vector<8x32xf32>
    %323 = arith.divf %321, %322 : vector<8x32xf32>
    %324 = vector.extract_strided_slice %317 {offsets = [0, 32], sizes = [8, 32], strides = [1, 1]} : vector<8x128xf32> to vector<8x32xf32>
    %325 = arith.negf %324 : vector<8x32xf32>
    %326 = math.exp %325 : vector<8x32xf32>
    %cst_89 = arith.constant 1.000000e+00 : f32
    %327 = vector.broadcast %cst_89 : f32 to vector<8x32xf32>
    %328 = arith.addf %327, %326 : vector<8x32xf32>
    %329 = arith.divf %327, %328 : vector<8x32xf32>
    %330 = vector.extract_strided_slice %317 {offsets = [0, 64], sizes = [8, 32], strides = [1, 1]} : vector<8x128xf32> to vector<8x32xf32>
    %331 = math.tanh %330 : vector<8x32xf32>
    %332 = vector.extract_strided_slice %317 {offsets = [0, 96], sizes = [8, 32], strides = [1, 1]} : vector<8x128xf32> to vector<8x32xf32>
    %333 = arith.negf %332 : vector<8x32xf32>
    %334 = math.exp %333 : vector<8x32xf32>
    %cst_90 = arith.constant 1.000000e+00 : f32
    %335 = vector.broadcast %cst_90 : f32 to vector<8x32xf32>
    %336 = arith.addf %335, %334 : vector<8x32xf32>
    %337 = arith.divf %335, %336 : vector<8x32xf32>
    %338 = arith.mulf %329, %311 : vector<8x32xf32>
    %339 = arith.mulf %323, %331 : vector<8x32xf32>
    %340 = arith.addf %338, %339 : vector<8x32xf32>
    %341 = math.tanh %340 : vector<8x32xf32>
    %342 = arith.mulf %337, %341 : vector<8x32xf32>
    %343 = vector.extract_strided_slice %253 {offsets = [24, 0], sizes = [8, 128], strides = [1, 1]} : vector<64x128xf32> to vector<8x128xf32>
    %c0_91 = arith.constant 0 : index
    %c0_92 = arith.constant 0 : index
    %344 = vector.load %arg5[%c0_91, %c0_92] : memref<32x128xf32, #tpu.memory_space<vmem>>, vector<32x128xf32>
    %cst_93 = arith.constant dense<0.000000e+00> : vector<8x128xf32>
    %345 = tpu.matmul %342, %344, %cst_93 {dimension_numbers = #tpu.dot_dimension_numbers<[1], [0], [0], [1], [0, 0, 1, 1], [], []>} : vector<8x32xf32>, vector<32x128xf32>, vector<8x128xf32> -> vector<8x128xf32>
    %346 = arith.addf %343, %345 : vector<8x128xf32>
    %347 = vector.extract_strided_slice %346 {offsets = [0, 0], sizes = [8, 32], strides = [1, 1]} : vector<8x128xf32> to vector<8x32xf32>
    %348 = arith.negf %347 : vector<8x32xf32>
    %349 = math.exp %348 : vector<8x32xf32>
    %cst_94 = arith.constant 1.000000e+00 : f32
    %350 = vector.broadcast %cst_94 : f32 to vector<8x32xf32>
    %351 = arith.addf %350, %349 : vector<8x32xf32>
    %352 = arith.divf %350, %351 : vector<8x32xf32>
    %353 = vector.extract_strided_slice %346 {offsets = [0, 32], sizes = [8, 32], strides = [1, 1]} : vector<8x128xf32> to vector<8x32xf32>
    %354 = arith.negf %353 : vector<8x32xf32>
    %355 = math.exp %354 : vector<8x32xf32>
    %cst_95 = arith.constant 1.000000e+00 : f32
    %356 = vector.broadcast %cst_95 : f32 to vector<8x32xf32>
    %357 = arith.addf %356, %355 : vector<8x32xf32>
    %358 = arith.divf %356, %357 : vector<8x32xf32>
    %359 = vector.extract_strided_slice %346 {offsets = [0, 64], sizes = [8, 32], strides = [1, 1]} : vector<8x128xf32> to vector<8x32xf32>
    %360 = math.tanh %359 : vector<8x32xf32>
    %361 = vector.extract_strided_slice %346 {offsets = [0, 96], sizes = [8, 32], strides = [1, 1]} : vector<8x128xf32> to vector<8x32xf32>
    %362 = arith.negf %361 : vector<8x32xf32>
    %363 = math.exp %362 : vector<8x32xf32>
    %cst_96 = arith.constant 1.000000e+00 : f32
    %364 = vector.broadcast %cst_96 : f32 to vector<8x32xf32>
    %365 = arith.addf %364, %363 : vector<8x32xf32>
    %366 = arith.divf %364, %365 : vector<8x32xf32>
    %367 = arith.mulf %358, %340 : vector<8x32xf32>
    %368 = arith.mulf %352, %360 : vector<8x32xf32>
    %369 = arith.addf %367, %368 : vector<8x32xf32>
    %370 = math.tanh %369 : vector<8x32xf32>
    %371 = arith.mulf %366, %370 : vector<8x32xf32>
    %372 = vector.extract_strided_slice %253 {offsets = [32, 0], sizes = [8, 128], strides = [1, 1]} : vector<64x128xf32> to vector<8x128xf32>
    %c0_97 = arith.constant 0 : index
    %c0_98 = arith.constant 0 : index
    %373 = vector.load %arg5[%c0_97, %c0_98] : memref<32x128xf32, #tpu.memory_space<vmem>>, vector<32x128xf32>
    %cst_99 = arith.constant dense<0.000000e+00> : vector<8x128xf32>
    %374 = tpu.matmul %371, %373, %cst_99 {dimension_numbers = #tpu.dot_dimension_numbers<[1], [0], [0], [1], [0, 0, 1, 1], [], []>} : vector<8x32xf32>, vector<32x128xf32>, vector<8x128xf32> -> vector<8x128xf32>
    %375 = arith.addf %372, %374 : vector<8x128xf32>
    %376 = vector.extract_strided_slice %375 {offsets = [0, 0], sizes = [8, 32], strides = [1, 1]} : vector<8x128xf32> to vector<8x32xf32>
    %377 = arith.negf %376 : vector<8x32xf32>
    %378 = math.exp %377 : vector<8x32xf32>
    %cst_100 = arith.constant 1.000000e+00 : f32
    %379 = vector.broadcast %cst_100 : f32 to vector<8x32xf32>
    %380 = arith.addf %379, %378 : vector<8x32xf32>
    %381 = arith.divf %379, %380 : vector<8x32xf32>
    %382 = vector.extract_strided_slice %375 {offsets = [0, 32], sizes = [8, 32], strides = [1, 1]} : vector<8x128xf32> to vector<8x32xf32>
    %383 = arith.negf %382 : vector<8x32xf32>
    %384 = math.exp %383 : vector<8x32xf32>
    %cst_101 = arith.constant 1.000000e+00 : f32
    %385 = vector.broadcast %cst_101 : f32 to vector<8x32xf32>
    %386 = arith.addf %385, %384 : vector<8x32xf32>
    %387 = arith.divf %385, %386 : vector<8x32xf32>
    %388 = vector.extract_strided_slice %375 {offsets = [0, 64], sizes = [8, 32], strides = [1, 1]} : vector<8x128xf32> to vector<8x32xf32>
    %389 = math.tanh %388 : vector<8x32xf32>
    %390 = vector.extract_strided_slice %375 {offsets = [0, 96], sizes = [8, 32], strides = [1, 1]} : vector<8x128xf32> to vector<8x32xf32>
    %391 = arith.negf %390 : vector<8x32xf32>
    %392 = math.exp %391 : vector<8x32xf32>
    %cst_102 = arith.constant 1.000000e+00 : f32
    %393 = vector.broadcast %cst_102 : f32 to vector<8x32xf32>
    %394 = arith.addf %393, %392 : vector<8x32xf32>
    %395 = arith.divf %393, %394 : vector<8x32xf32>
    %396 = arith.mulf %387, %369 : vector<8x32xf32>
    %397 = arith.mulf %381, %389 : vector<8x32xf32>
    %398 = arith.addf %396, %397 : vector<8x32xf32>
    %399 = math.tanh %398 : vector<8x32xf32>
    %400 = arith.mulf %395, %399 : vector<8x32xf32>
    %401 = vector.extract_strided_slice %253 {offsets = [40, 0], sizes = [8, 128], strides = [1, 1]} : vector<64x128xf32> to vector<8x128xf32>
    %c0_103 = arith.constant 0 : index
    %c0_104 = arith.constant 0 : index
    %402 = vector.load %arg5[%c0_103, %c0_104] : memref<32x128xf32, #tpu.memory_space<vmem>>, vector<32x128xf32>
    %cst_105 = arith.constant dense<0.000000e+00> : vector<8x128xf32>
    %403 = tpu.matmul %400, %402, %cst_105 {dimension_numbers = #tpu.dot_dimension_numbers<[1], [0], [0], [1], [0, 0, 1, 1], [], []>} : vector<8x32xf32>, vector<32x128xf32>, vector<8x128xf32> -> vector<8x128xf32>
    %404 = arith.addf %401, %403 : vector<8x128xf32>
    %405 = vector.extract_strided_slice %404 {offsets = [0, 0], sizes = [8, 32], strides = [1, 1]} : vector<8x128xf32> to vector<8x32xf32>
    %406 = arith.negf %405 : vector<8x32xf32>
    %407 = math.exp %406 : vector<8x32xf32>
    %cst_106 = arith.constant 1.000000e+00 : f32
    %408 = vector.broadcast %cst_106 : f32 to vector<8x32xf32>
    %409 = arith.addf %408, %407 : vector<8x32xf32>
    %410 = arith.divf %408, %409 : vector<8x32xf32>
    %411 = vector.extract_strided_slice %404 {offsets = [0, 32], sizes = [8, 32], strides = [1, 1]} : vector<8x128xf32> to vector<8x32xf32>
    %412 = arith.negf %411 : vector<8x32xf32>
    %413 = math.exp %412 : vector<8x32xf32>
    %cst_107 = arith.constant 1.000000e+00 : f32
    %414 = vector.broadcast %cst_107 : f32 to vector<8x32xf32>
    %415 = arith.addf %414, %413 : vector<8x32xf32>
    %416 = arith.divf %414, %415 : vector<8x32xf32>
    %417 = vector.extract_strided_slice %404 {offsets = [0, 64], sizes = [8, 32], strides = [1, 1]} : vector<8x128xf32> to vector<8x32xf32>
    %418 = math.tanh %417 : vector<8x32xf32>
    %419 = vector.extract_strided_slice %404 {offsets = [0, 96], sizes = [8, 32], strides = [1, 1]} : vector<8x128xf32> to vector<8x32xf32>
    %420 = arith.negf %419 : vector<8x32xf32>
    %421 = math.exp %420 : vector<8x32xf32>
    %cst_108 = arith.constant 1.000000e+00 : f32
    %422 = vector.broadcast %cst_108 : f32 to vector<8x32xf32>
    %423 = arith.addf %422, %421 : vector<8x32xf32>
    %424 = arith.divf %422, %423 : vector<8x32xf32>
    %425 = arith.mulf %416, %398 : vector<8x32xf32>
    %426 = arith.mulf %410, %418 : vector<8x32xf32>
    %427 = arith.addf %425, %426 : vector<8x32xf32>
    %428 = math.tanh %427 : vector<8x32xf32>
    %429 = arith.mulf %424, %428 : vector<8x32xf32>
    %430 = vector.extract_strided_slice %253 {offsets = [48, 0], sizes = [8, 128], strides = [1, 1]} : vector<64x128xf32> to vector<8x128xf32>
    %c0_109 = arith.constant 0 : index
    %c0_110 = arith.constant 0 : index
    %431 = vector.load %arg5[%c0_109, %c0_110] : memref<32x128xf32, #tpu.memory_space<vmem>>, vector<32x128xf32>
    %cst_111 = arith.constant dense<0.000000e+00> : vector<8x128xf32>
    %432 = tpu.matmul %429, %431, %cst_111 {dimension_numbers = #tpu.dot_dimension_numbers<[1], [0], [0], [1], [0, 0, 1, 1], [], []>} : vector<8x32xf32>, vector<32x128xf32>, vector<8x128xf32> -> vector<8x128xf32>
    %433 = arith.addf %430, %432 : vector<8x128xf32>
    %434 = vector.extract_strided_slice %433 {offsets = [0, 0], sizes = [8, 32], strides = [1, 1]} : vector<8x128xf32> to vector<8x32xf32>
    %435 = arith.negf %434 : vector<8x32xf32>
    %436 = math.exp %435 : vector<8x32xf32>
    %cst_112 = arith.constant 1.000000e+00 : f32
    %437 = vector.broadcast %cst_112 : f32 to vector<8x32xf32>
    %438 = arith.addf %437, %436 : vector<8x32xf32>
    %439 = arith.divf %437, %438 : vector<8x32xf32>
    %440 = vector.extract_strided_slice %433 {offsets = [0, 32], sizes = [8, 32], strides = [1, 1]} : vector<8x128xf32> to vector<8x32xf32>
    %441 = arith.negf %440 : vector<8x32xf32>
    %442 = math.exp %441 : vector<8x32xf32>
    %cst_113 = arith.constant 1.000000e+00 : f32
    %443 = vector.broadcast %cst_113 : f32 to vector<8x32xf32>
    %444 = arith.addf %443, %442 : vector<8x32xf32>
    %445 = arith.divf %443, %444 : vector<8x32xf32>
    %446 = vector.extract_strided_slice %433 {offsets = [0, 64], sizes = [8, 32], strides = [1, 1]} : vector<8x128xf32> to vector<8x32xf32>
    %447 = math.tanh %446 : vector<8x32xf32>
    %448 = vector.extract_strided_slice %433 {offsets = [0, 96], sizes = [8, 32], strides = [1, 1]} : vector<8x128xf32> to vector<8x32xf32>
    %449 = arith.negf %448 : vector<8x32xf32>
    %450 = math.exp %449 : vector<8x32xf32>
    %cst_114 = arith.constant 1.000000e+00 : f32
    %451 = vector.broadcast %cst_114 : f32 to vector<8x32xf32>
    %452 = arith.addf %451, %450 : vector<8x32xf32>
    %453 = arith.divf %451, %452 : vector<8x32xf32>
    %454 = arith.mulf %445, %427 : vector<8x32xf32>
    %455 = arith.mulf %439, %447 : vector<8x32xf32>
    %456 = arith.addf %454, %455 : vector<8x32xf32>
    %457 = math.tanh %456 : vector<8x32xf32>
    %458 = arith.mulf %453, %457 : vector<8x32xf32>
    %459 = vector.extract_strided_slice %253 {offsets = [56, 0], sizes = [8, 128], strides = [1, 1]} : vector<64x128xf32> to vector<8x128xf32>
    %c0_115 = arith.constant 0 : index
    %c0_116 = arith.constant 0 : index
    %460 = vector.load %arg5[%c0_115, %c0_116] : memref<32x128xf32, #tpu.memory_space<vmem>>, vector<32x128xf32>
    %cst_117 = arith.constant dense<0.000000e+00> : vector<8x128xf32>
    %461 = tpu.matmul %458, %460, %cst_117 {dimension_numbers = #tpu.dot_dimension_numbers<[1], [0], [0], [1], [0, 0, 1, 1], [], []>} : vector<8x32xf32>, vector<32x128xf32>, vector<8x128xf32> -> vector<8x128xf32>
    %462 = arith.addf %459, %461 : vector<8x128xf32>
    %463 = vector.extract_strided_slice %462 {offsets = [0, 0], sizes = [8, 32], strides = [1, 1]} : vector<8x128xf32> to vector<8x32xf32>
    %464 = arith.negf %463 : vector<8x32xf32>
    %465 = math.exp %464 : vector<8x32xf32>
    %cst_118 = arith.constant 1.000000e+00 : f32
    %466 = vector.broadcast %cst_118 : f32 to vector<8x32xf32>
    %467 = arith.addf %466, %465 : vector<8x32xf32>
    %468 = arith.divf %466, %467 : vector<8x32xf32>
    %469 = vector.extract_strided_slice %462 {offsets = [0, 32], sizes = [8, 32], strides = [1, 1]} : vector<8x128xf32> to vector<8x32xf32>
    %470 = arith.negf %469 : vector<8x32xf32>
    %471 = math.exp %470 : vector<8x32xf32>
    %cst_119 = arith.constant 1.000000e+00 : f32
    %472 = vector.broadcast %cst_119 : f32 to vector<8x32xf32>
    %473 = arith.addf %472, %471 : vector<8x32xf32>
    %474 = arith.divf %472, %473 : vector<8x32xf32>
    %475 = vector.extract_strided_slice %462 {offsets = [0, 64], sizes = [8, 32], strides = [1, 1]} : vector<8x128xf32> to vector<8x32xf32>
    %476 = math.tanh %475 : vector<8x32xf32>
    %477 = vector.extract_strided_slice %462 {offsets = [0, 96], sizes = [8, 32], strides = [1, 1]} : vector<8x128xf32> to vector<8x32xf32>
    %478 = arith.negf %477 : vector<8x32xf32>
    %479 = math.exp %478 : vector<8x32xf32>
    %cst_120 = arith.constant 1.000000e+00 : f32
    %480 = vector.broadcast %cst_120 : f32 to vector<8x32xf32>
    %481 = arith.addf %480, %479 : vector<8x32xf32>
    %482 = arith.divf %480, %481 : vector<8x32xf32>
    %483 = arith.mulf %474, %456 : vector<8x32xf32>
    %484 = arith.mulf %468, %476 : vector<8x32xf32>
    %485 = arith.addf %483, %484 : vector<8x32xf32>
    %486 = math.tanh %485 : vector<8x32xf32>
    %487 = arith.mulf %482, %486 : vector<8x32xf32>
    %c0_121 = arith.constant 0 : index
    %c0_122 = arith.constant 0 : index
    %488 = vector.load %arg7[%c0_121, %c0_122] : memref<32x1xf32, #tpu.memory_space<vmem>>, vector<32x1xf32>
    %cst_123 = arith.constant dense<0.000000e+00> : vector<8x1xf32>
    %489 = tpu.matmul %487, %488, %cst_123 {dimension_numbers = #tpu.dot_dimension_numbers<[1], [0], [0], [1], [0, 0, 1, 1], [], []>} : vector<8x32xf32>, vector<32x1xf32>, vector<8x1xf32> -> vector<8x1xf32>
    %c0_124 = arith.constant 0 : index
    %c0_125 = arith.constant 0 : index
    %490 = vector.load %arg8[%c0_124, %c0_125] : memref<1x1xf32, #tpu.memory_space<vmem>>, vector<1x1xf32>
    %491 = vector.broadcast %490 : vector<1x1xf32> to vector<8x1xf32>
    %492 = arith.addf %489, %491 : vector<8x1xf32>
    %c0_126 = arith.constant 0 : index
    %c0_127 = arith.constant 0 : index
    %493 = vector.load %arg9[%c0_126, %c0_127] : memref<8x1xf32, #tpu.memory_space<vmem>>, vector<8x1xf32>
    tpu.vector_store %arg9[%c0_126, %c0_127], %492 {strides = array<i32>} : memref<8x1xf32, #tpu.memory_space<vmem>>, vector<8x1xf32>,
    return
  }
}

</mosaic_0001>

<bundles_post_ra>
// kernel: lstm_model_forward.1
= control target key start
LH: loop header
LB: loop body
LE: loop exit
PB: predicated region body
PF: predicated region fallthrough
CT: control target
= control target key end

     0   :  { %vm75_vm0 = vcmask 1043456   ;;  %vm50_vm1 = vcmask 31744   ;;  %v2694_v0 = vmov 0.0|0.0   ;;  %vm2695_vm2 = vmmov 0   ;;  %s2697_s23 = smov 64   ;;  %s3108_s2 = inlined_call_operand.vmem [shape: f32[32,128], index: 2, kind: input, shape index: {}]   ;;  %s3109_s1 = inlined_call_operand.vmem [shape: f32[4,128], index: 1, kind: input, shape index: {}]   ;;  %s3110_s0 = inlined_call_operand.vmem [shape: f32[64,4], index: 0, kind: input, shape index: {}]   ;;  %s3111_s3 = inlined_call_operand.vmem [shape: f32[1,128], index: 3, kind: input, shape index: {}]   ;;  %s3112_s4 = inlined_call_operand.vmem [shape: f32[32,128], index: 4, kind: input, shape index: {}]   ;;  %s3113_s5 = inlined_call_operand.vmem [shape: f32[32,128], index: 5, kind: input, shape index: {}]   ;;  %s3114_s6 = inlined_call_operand.vmem [shape: f32[1,128], index: 6, kind: input, shape index: {}]   ;;  %s3115_s7 = inlined_call_operand.vmem [shape: f32[32,1], index: 7, kind: input, shape index: {}]   ;;  %s3116_s8 = inlined_call_operand.<no memory space> [shape: f32[1,1], index: 8, kind: input, shape index: {}]   ;;  %s3117_s9 = inlined_call_operand.vmem [shape: f32[8,1], index: 9, kind: output, shape index: {}]  }
   0x1   :  { %2451 = vmatprep.subr.bf16.mxu1 %v2694_v0  ;;  %v184_v1 = vld [vmem:[%s3108_s2] sm:$0xff]  ;;  %v185_v2 = vld [vmem:[%s3108_s2 + $0x8] sm:$0xff]  ;;  %v186_v7 = vld [vmem:[%s3108_s2 + $0x10] sm:$0xff]  ;;  %v2696_v8 = vmov 0.0   ;;  %vm188_vm3 = vcmask 261120   ;;  %vm2067_vm4 = vcmask 7168  }
   0x2   :  { %v42_v3 = vld [vmem:[%s3109_s1] sm:$0xf]  ;;  %v2759_v4 = vpack.c.bf16 %v185_v2, %v184_v1  ;;  %v35_v6 = vld [vmem:[%s3110_s0 + $0x8] sm:$0xff]  ;;  %2252 = vmatprep.mubr.msk.f32.mxu1 %vm2695_vm2, %v2696_v8  ;;  %v187_v9 = vld [vmem:[%s3108_s2 + $0x18] sm:$0xff] }
   0x3   :  { %2230 = vmatprep.subr.msk.mxu0 %vm75_vm0, %v42_v3  ;;  %v34_v5 = vld [vmem:[%s3110_s0] sm:$0xff]  ;;  %v2780_v10 = vpack.c.bf16 %v187_v9, %v186_v7  ;;  %v36_v46 = vld [vmem:[%s3110_s0 + $0x10] sm:$0xff]  ;;  %v37_v47 = vld [vmem:[%s3110_s0 + $0x18] sm:$0xff] }
   0x4   :  { %2231 = vmatpush3.msk.msra.mxu0 %vm75_vm0, %v42_v3  ;;  %2232 = vmatprep.mubr.msk.f32.mxu0 %vm50_vm1, %v34_v5  ;;  %v2800_v12 = vld [vmem:[%s3111_s3] ss:$0 sm:$0xff]  ;;  %s2698_s3 = smov 32   ;;  %v39_v49 = vld [vmem:[%s3110_s0 + $0x28] sm:$0xff]  ;;  %v40_v50 = vld [vmem:[%s3110_s0 + $0x30] sm:$0xff] }
   0x5   :  { %2453 = vmatpush3.bf16.msra.mxu1 %v2759_v4  ;;  %2233 = vmatmul.mubr.msk.f32.vlgmr.msra.gmra.mrb[0].mxu0 %vm50_vm1, %v35_v6  ;;  %v38_v48 = vld [vmem:[%s3110_s0 + $0x20] sm:$0xff]  ;;  %v41_v51 = vld [vmem:[%s3110_s0 + $0x38] sm:$0xff] }
   0x6   :  { %2454 = vmatprep.subr.bf16.mxu1 %v2694_v0  ;;  %2463 = vmatprep.subr.bf16.mxu0 %v2694_v0 }
   0x7   :  { %2465 = vmatpush3.bf16.msra.mxu0 %v2759_v4  ;;  %2235 = vmatprep.mubr.msk.f32.mxu0 %vm50_vm1, %v36_v46 }
   0x8   :  { %2466 = vmatprep.subr.bf16.mxu0 %v2694_v0 }
   0x9   :  { %2456 = vmatpush3.bf16.msra.mxu1 %v2780_v10  ;;  %2236 = vmatmul.mubr.msk.f32.gmra.mrb[2].mxu0 %vm50_vm1, %v37_v47 }
   0xa   :  { %2457 = vmatprep.subr.bf16.mxu1 %v2694_v0  ;;  %2238 = vmatprep.mubr.msk.f32.mxu0 %vm50_vm1, %v38_v48 }
   0xb   :  { %2468 = vmatpush3.bf16.msra.mxu0 %v2780_v10 }
   0xc   :  { %2253 = vmatmul.mubr.f32.vlgmr.msra.gmra.mrb[0].mxu1 %v2696_v8  ;;  %2475 = vmatprep.subr.bf16.mxu0 %v2694_v0 }
   0xd   :  { %2459 = vmatpush3.bf16.msra.mxu1 %v2759_v4  ;;  %2263 = vmatprep.mubr.msk.f32.mxu1 %vm2695_vm2, %v2696_v8 }
   0xe   :  { %2460 = vmatprep.subr.bf16.mxu1 %v2694_v0  ;;  %2239 = vmatmul.mubr.msk.f32.gmra.mrb[4].mxu0 %vm50_vm1, %v39_v49 }
   0xf   :  { %2241 = vmatprep.mubr.msk.f32.mxu0 %vm50_vm1, %v40_v50 }
  0x11   :  { %2462 = vmatpush3.bf16.msra.mxu1 %v2780_v10 }
  0x12   :  { %2469 = vmatprep.subr.bf16.mxu1 %v2694_v0  ;;  %2242 = vmatmul.mubr.msk.f32.gmra.mrb[6].mxu0 %vm50_vm1, %v41_v51 }
  0x13   :  { %2274 = vmatprep.mubr.msk.f32.mxu0 %vm2695_vm2, %v2696_v8 }
  0xd8   :  { %v2234_v11 = vpop.f32.mrb[0].mxu0 }
  0xd9   :  { %v145_v13 = vpop.f32.mrb[1].mxu0  ;;  %v151_v32 = vadd.f32 %v2234_v11, %v2800_v12 }
  0xda   :  { %v146_v14 = vadd.f32 %v2800_v12, %v145_v13 }
  0xdc   :  { %v2237_v55 = vpop.f32.mrb[2].mxu0 }
  0xdd   :  { %v155_v56 = vpop.f32.mrb[3].mxu0 }
  0xde   :  { %v156_v62 = vadd.f32 %v2800_v12, %v155_v56 }
  0xdf   :  { %v258_v15 = vpop.f32.mrb[0].mxu1 }
  0xe0   :  { %v262_v16 = vadd.f32 %v258_v15, %v146_v14  ;;  %v2254_v17 = vpop.f32.mrb[1].mxu1 }
  0xe1   :  { %v2846_v57 = vpop.f32.mrb[4].mxu0 }
  0xe2   :  { %2566 = vtanh.f32 %v262_v16  ;;  %v2083_v19 = vmul.f32 -1.442695, %v262_v16  ;;  %v2848_v58 = vpop.f32.mrb[5].mxu0 }
  0xe4   :  { %2568 = vpow2.f32 %v2083_v19 }
  0xe5   :  { %v2850_v59 = vpop.f32.mrb[6].mxu0 }
  0xe6   :  { %v2852_v60 = vpop.f32.mrb[7].mxu0 }
  0xec   :  { %v2567_v18 = vpop.eup %2566 }
  0xed   :  { %272 = vrot.lane.b32.xlu0 %v2567_v18, %s2697_s23 }
  0xee   :  { %v2569_v20 = vpop.eup %2568 }
  0xef   :  { %v266_v21 = vadd.f32 1.0, %v2569_v20 }
  0xf1   :  { %2570 = vrcp.f32 %v266_v21  ;;  %v161_v21 = vadd.f32 %v2237_v55, %v2800_v12 }
  0xfb   :  { %v2571_v22 = vpop.eup %2570 }
  0xfc   :  { %v270_v25 = vmul.f32 0.0, %v2571_v22 }
 0x15f   :  { %v273_v23 = vpop.permute.xlu0 %272 }
 0x160   :  { %v275_v24 = vmul.f32 %v2571_v22, %v273_v23 }
 0x162   :  { %277 = vrot.lane.b32.xlu0 %v275_v24, %s2698_s3 }
 0x1d4   :  { %v278_v26 = vpop.permute.xlu0 %277 }
 0x1d5   :  { %v280_v27 = vadd.f32 %v278_v26, %v270_v25 }
 0x1d7   :  { %2572 = vtanh.f32 %v280_v27 }
 0x1e1   :  { %v2573_v28 = vpop.eup %2572 }
 0x1e2   :  { %283 = vrot.lane.b32.xlu1 %v2573_v28, %s2697_s23 }
 0x254   :  { %v284_v29 = vpop.permute.xlu1 %283 }
 0x255   :  { %v286_v30 = vmul.f32 %v2571_v22, %v284_v29 }
 0x257   :  { %288 = vrot.lane.b32.xlu1 %v286_v30, %s2698_s3 }
 0x2c9   :  { %v289_v31 = vpop.permute.xlu1 %288 }
 0x2ca   :  { %291 = vst.msk [vmem:[#allocation2] sm:$0xff] %vm188_vm3, %v289_v31  ;;  %2264 = vmatmul.mubr.msk.f32.vlgmr.msra.gmra.mrb[2].mxu1 %vm188_vm3, %v289_v31 }
 0x2cb   :  { %2471 = vmatpush3.bf16.msra.mxu1 %v2759_v4  ;;  %2285 = vmatprep.mubr.msk.f32.mxu1 %vm2695_vm2, %v2696_v8 }
 0x2cc   :  { %2472 = vmatprep.subr.bf16.mxu1 %v2694_v0 }
 0x2cf   :  { %2474 = vmatpush3.bf16.msra.mxu1 %v2780_v10 }
 0x2d0   :  { %2481 = vmatprep.subr.bf16.mxu1 %v2694_v0 }
 0x39d   :  { %v364_v33 = vpop.f32.mrb[2].mxu1 }
 0x39e   :  { %v368_v34 = vadd.f32 %v364_v33, %v151_v32  ;;  %v2265_v35 = vpop.f32.mrb[3].mxu1 }
 0x3a0   :  { %2574 = vtanh.f32 %v368_v34  ;;  %v2085_v37 = vmul.f32 -1.442695, %v368_v34 }
 0x3a2   :  { %2576 = vpow2.f32 %v2085_v37 }
 0x3aa   :  { %v2575_v36 = vpop.eup %2574 }
 0x3ab   :  { %378 = vrot.lane.b32.xlu0 %v2575_v36, %s2697_s23 }
 0x3ac   :  { %v2577_v38 = vpop.eup %2576 }
 0x3ad   :  { %v372_v39 = vadd.f32 1.0, %v2577_v38 }
 0x3af   :  { %2578 = vrcp.f32 %v372_v39  ;;  %v166_v39 = vadd.f32 %v2800_v12, %v2848_v58  ;;  %v171_v58 = vadd.f32 %v2846_v57, %v2800_v12 }
 0x3b9   :  { %v2579_v40 = vpop.eup %2578 }
 0x3ba   :  { %v376_v43 = vmul.f32 %v2579_v40, %v280_v27 }
 0x41d   :  { %v379_v41 = vpop.permute.xlu0 %378 }
 0x41e   :  { %v381_v42 = vmul.f32 %v2579_v40, %v379_v41 }
 0x420   :  { %383 = vrot.lane.b32.xlu1 %v381_v42, %s2698_s3 }
 0x492   :  { %v384_v44 = vpop.permute.xlu1 %383 }
 0x493   :  { %v386_v45 = vadd.f32 %v384_v44, %v376_v43 }
 0x495   :  { %2580 = vtanh.f32 %v386_v45 }
 0x49f   :  { %v2581_v52 = vpop.eup %2580 }
 0x4a0   :  { %389 = vrot.lane.b32.xlu0 %v2581_v52, %s2697_s23 }
 0x512   :  { %v390_v53 = vpop.permute.xlu0 %389 }
 0x513   :  { %v392_v54 = vmul.f32 %v2579_v40, %v390_v53 }
 0x515   :  { %394 = vrot.lane.b32.xlu1 %v392_v54, %s2698_s3 }
 0x587   :  { %v395_v61 = vpop.permute.xlu1 %394 }
 0x588   :  { %397 = vst.msk [vmem:[#allocation2 + $0x8] sm:$0xff] %vm188_vm3, %v395_v61  ;;  %2275 = vmatmul.mubr.msk.f32.vlgmr.msra.gmra.mrb[8].mxu0 %vm188_vm3, %v395_v61 }
 0x589   :  { %2477 = vmatpush3.bf16.msra.mxu0 %v2759_v4  ;;  %2296 = vmatprep.mubr.msk.f32.mxu0 %vm2695_vm2, %v2696_v8 }
 0x58a   :  { %2478 = vmatprep.subr.bf16.mxu0 %v2694_v0 }
 0x58d   :  { %2480 = vmatpush3.bf16.msra.mxu0 %v2780_v10 }
 0x58e   :  { %2487 = vmatprep.subr.bf16.mxu0 %v2694_v0 }
 0x65b   :  { %v470_v63 = vpop.f32.mrb[8].mxu0 }
 0x65c   :  { %v474_v1 = vadd.f32 %v470_v63, %v156_v62  ;;  %v2276_v2 = vpop.f32.mrb[9].mxu0 }
 0x65e   :  { %2582 = vtanh.f32 %v474_v1  ;;  %v2087_v5 = vmul.f32 -1.442695, %v474_v1 }
 0x660   :  { %2584 = vpow2.f32 %v2087_v5 }
 0x668   :  { %v2583_v3 = vpop.eup %2582 }
 0x669   :  { %484 = vrot.lane.b32.xlu0 %v2583_v3, %s2697_s23 }
 0x66a   :  { %v2585_v6 = vpop.eup %2584 }
 0x66b   :  { %v478_v7 = vadd.f32 1.0, %v2585_v6 }
 0x66d   :  { %2586 = vrcp.f32 %v478_v7 }
 0x677   :  { %v2587_v9 = vpop.eup %2586 }
 0x678   :  { %v482_v14 = vmul.f32 %v2587_v9, %v386_v45 }
 0x6db   :  { %v485_v11 = vpop.permute.xlu0 %484 }
 0x6dc   :  { %v487_v13 = vmul.f32 %v2587_v9, %v485_v11  ;;  %v1042_v11 = vld [vmem:[%s3112_s4] sm:$0xff] }
 0x6de   :  { %489 = vrot.lane.b32.xlu1 %v487_v13, %s2698_s3  ;;  %v1043_v13 = vld [vmem:[%s3112_s4 + $0x8] sm:$0xff] }
 0x750   :  { %v490_v15 = vpop.permute.xlu1 %489 }
 0x751   :  { %v492_v16 = vadd.f32 %v490_v15, %v482_v14  ;;  %v2499_v14 = vpack.c.bf16 %v1043_v13, %v1042_v11 }
 0x753   :  { %2588 = vtanh.f32 %v492_v16 }
 0x75d   :  { %v2589_v17 = vpop.eup %2588 }
 0x75e   :  { %495 = vrot.lane.b32.xlu0 %v2589_v17, %s2697_s23 }
 0x7d0   :  { %v496_v18 = vpop.permute.xlu0 %495 }
 0x7d1   :  { %v498_v19 = vmul.f32 %v2587_v9, %v496_v18  ;;  %v1044_v18 = vld [vmem:[%s3112_s4 + $0x10] sm:$0xff] }
 0x7d3   :  { %500 = vrot.lane.b32.xlu1 %v498_v19, %s2698_s3  ;;  %v1045_v19 = vld [vmem:[%s3112_s4 + $0x18] sm:$0xff] }
 0x845   :  { %v501_v20 = vpop.permute.xlu1 %500 }
 0x846   :  { %503 = vst.msk [vmem:[#allocation2 + $0x10] sm:$0xff] %vm188_vm3, %v501_v20  ;;  %2286 = vmatmul.mubr.msk.f32.vlgmr.msra.gmra.mrb[4].mxu1 %vm188_vm3, %v501_v20  ;;  %v2503_v20 = vpack.c.bf16 %v1045_v19, %v1044_v18 }
 0x847   :  { %2483 = vmatpush3.bf16.msra.mxu1 %v2759_v4  ;;  %2307 = vmatprep.mubr.msk.f32.mxu1 %vm2695_vm2, %v2696_v8 }
 0x848   :  { %2484 = vmatprep.subr.bf16.mxu1 %v2694_v0 }
 0x84b   :  { %2486 = vmatpush3.bf16.msra.mxu1 %v2780_v10 }
 0x84c   :  { %2493 = vmatprep.subr.bf16.mxu1 %v2694_v0 }
 0x919   :  { %v576_v22 = vpop.f32.mrb[4].mxu1 }
 0x91a   :  { %v580_v23 = vadd.f32 %v576_v22, %v161_v21  ;;  %v2287_v24 = vpop.f32.mrb[5].mxu1  ;;  %v1034_v22 = vld [vmem:[#allocation2] sm:$0xff] }
 0x91b   :  { %v1036_v24 = vld [vmem:[#allocation2 + $0x10] sm:$0xff] }
 0x91c   :  { %2590 = vtanh.f32 %v580_v23  ;;  %v2089_v26 = vmul.f32 -1.442695, %v580_v23  ;;  %v1035_v23 = vld [vmem:[#allocation2 + $0x8] sm:$0xff] }
 0x91e   :  { %2592 = vpow2.f32 %v2089_v26 }
 0x926   :  { %v2591_v25 = vpop.eup %2590 }
 0x927   :  { %590 = vrot.lane.b32.xlu0 %v2591_v25, %s2697_s23 }
 0x928   :  { %v2593_v27 = vpop.eup %2592 }
 0x929   :  { %v584_v28 = vadd.f32 1.0, %v2593_v27 }
 0x92b   :  { %2594 = vrcp.f32 %v584_v28  ;;  %v176_v28 = vadd.f32 %v2800_v12, %v2852_v60 }
 0x935   :  { %v2595_v29 = vpop.eup %2594 }
 0x936   :  { %v588_v32 = vmul.f32 %v2595_v29, %v492_v16 }
 0x999   :  { %v591_v30 = vpop.permute.xlu0 %590 }
 0x99a   :  { %v593_v31 = vmul.f32 %v2595_v29, %v591_v30 }
 0x99c   :  { %595 = vrot.lane.b32.xlu1 %v593_v31, %s2698_s3 }
 0xa0e   :  { %v596_v33 = vpop.permute.xlu1 %595 }
 0xa0f   :  { %v598_v34 = vadd.f32 %v596_v33, %v588_v32 }
 0xa11   :  { %2596 = vtanh.f32 %v598_v34 }
 0xa1b   :  { %v2597_v35 = vpop.eup %2596 }
 0xa1c   :  { %601 = vrot.lane.b32.xlu0 %v2597_v35, %s2697_s23 }
 0xa8e   :  { %v602_v36 = vpop.permute.xlu0 %601 }
 0xa8f   :  { %v604_v37 = vmul.f32 %v2595_v29, %v602_v36 }
 0xa91   :  { %606 = vrot.lane.b32.xlu1 %v604_v37, %s2698_s3 }
 0xb03   :  { %v607_v38 = vpop.permute.xlu1 %606 }
 0xb04   :  { %609 = vst.msk [vmem:[#allocation2 + $0x18] sm:$0xff] %vm188_vm3, %v607_v38  ;;  %2297 = vmatmul.mubr.msk.f32.vlgmr.msra.gmra.mrb[10].mxu0 %vm188_vm3, %v607_v38 }
 0xb05   :  { %2489 = vmatpush3.bf16.msra.mxu0 %v2759_v4  ;;  %2318 = vmatprep.mubr.msk.f32.mxu0 %vm2695_vm2, %v2696_v8 }
 0xb06   :  { %2490 = vmatprep.subr.bf16.mxu0 %v2694_v0 }
 0xb09   :  { %2492 = vmatpush3.bf16.msra.mxu0 %v2780_v10 }
 0xb0a   :  { %2500 = vmatprep.subr.bf16.mxu0 %v2499_v14 }
 0xb0b   :  { %v1037_v25 = vld [vmem:[#allocation2 + $0x18] sm:$0xff] }
 0xbd7   :  { %v682_v40 = vpop.f32.mrb[10].mxu0 }
 0xbd8   :  { %v686_v41 = vadd.f32 %v682_v40, %v166_v39  ;;  %v2298_v42 = vpop.f32.mrb[11].mxu0 }
 0xbda   :  { %2598 = vtanh.f32 %v686_v41  ;;  %v2091_v44 = vmul.f32 -1.442695, %v686_v41 }
 0xbdc   :  { %2600 = vpow2.f32 %v2091_v44 }
 0xbe4   :  { %v2599_v43 = vpop.eup %2598 }
 0xbe5   :  { %696 = vrot.lane.b32.xlu0 %v2599_v43, %s2697_s23 }
 0xbe6   :  { %v2601_v45 = vpop.eup %2600 }
 0xbe7   :  { %v690_v46 = vadd.f32 1.0, %v2601_v45 }
 0xbe9   :  { %2602 = vrcp.f32 %v690_v46 }
 0xbf3   :  { %v2603_v47 = vpop.eup %2602 }
 0xbf4   :  { %v694_v50 = vmul.f32 %v2603_v47, %v598_v34 }
 0xc57   :  { %v697_v48 = vpop.permute.xlu0 %696 }
 0xc58   :  { %v699_v49 = vmul.f32 %v2603_v47, %v697_v48  ;;  %v1182_v48 = vld [vmem:[%s3113_s5] sm:$0xff] }
 0xc5a   :  { %701 = vrot.lane.b32.xlu1 %v699_v49, %s2698_s3  ;;  %v1183_v49 = vld [vmem:[%s3113_s5 + $0x8] sm:$0xff] }
 0xccc   :  { %v702_v51 = vpop.permute.xlu1 %701 }
 0xccd   :  { %v704_v52 = vadd.f32 %v702_v51, %v694_v50  ;;  %v2952_v50 = vpack.c.bf16 %v1183_v49, %v1182_v48  ;;  %v1184_v51 = vld [vmem:[%s3113_s5 + $0x10] sm:$0xff] }
 0xccf   :  { %2604 = vtanh.f32 %v704_v52 }
 0xcd9   :  { %v2605_v53 = vpop.eup %2604 }
 0xcda   :  { %707 = vrot.lane.b32.xlu0 %v2605_v53, %s2697_s23 }
 0xd4c   :  { %v708_v54 = vpop.permute.xlu0 %707 }
 0xd4d   :  { %v710_v55 = vmul.f32 %v2603_v47, %v708_v54 }
 0xd4f   :  { %712 = vrot.lane.b32.xlu1 %v710_v55, %s2698_s3 }
 0xdc1   :  { %v713_v56 = vpop.permute.xlu1 %712 }
 0xdc2   :  { %715 = vst.msk [vmem:[#allocation2 + $0x20] sm:$0xff] %vm188_vm3, %v713_v56  ;;  %2308 = vmatmul.mubr.msk.f32.vlgmr.msra.gmra.mrb[6].mxu1 %vm188_vm3, %v713_v56 }
 0xdc3   :  { %2495 = vmatpush3.bf16.msra.mxu1 %v2759_v4  ;;  %2329 = vmatprep.mubr.msk.f32.mxu1 %vm2695_vm2, %v2696_v8 }
 0xdc4   :  { %2496 = vmatprep.subr.bf16.mxu1 %v2694_v0 }
 0xdc7   :  { %2498 = vmatpush3.bf16.msra.mxu1 %v2780_v10 }
 0xdc8   :  { %2507 = vmatprep.subr.bf16.mxu1 %v2694_v0 }
 0xdc9   :  { %v1038_v26 = vld [vmem:[#allocation2 + $0x20] sm:$0xff] }
 0xe95   :  { %v788_v61 = vpop.f32.mrb[6].mxu1 }
 0xe96   :  { %v792_v62 = vadd.f32 %v788_v61, %v171_v58  ;;  %v2309_v63 = vpop.f32.mrb[7].mxu1  ;;  %v181_v61 = vadd.f32 %v2850_v59, %v2800_v12 }
 0xe98   :  { %2606 = vtanh.f32 %v792_v62  ;;  %v2093_v4 = vmul.f32 -1.442695, %v792_v62 }
 0xe9a   :  { %2608 = vpow2.f32 %v2093_v4  ;;  %v2988_v4 = vld [vmem:[%s3114_s6] ss:$0 sm:$0xff] }
 0xea2   :  { %v2607_v1 = vpop.eup %2606 }
 0xea3   :  { %802 = vrot.lane.b32.xlu0 %v2607_v1, %s2697_s23 }
 0xea4   :  { %v2609_v2 = vpop.eup %2608 }
 0xea5   :  { %v796_v3 = vadd.f32 1.0, %v2609_v2 }
 0xea7   :  { %2610 = vrcp.f32 %v796_v3 }
 0xeb1   :  { %v2611_v5 = vpop.eup %2610 }
 0xeb2   :  { %v800_v7 = vmul.f32 %v2611_v5, %v704_v52  ;;  %v1185_v52 = vld [vmem:[%s3113_s5 + $0x18] sm:$0xff] }
 0xeb3   :  { %v2962_v53 = vpack.c.bf16 %v1185_v52, %v1184_v51 }
 0xf15   :  { %v803_v6 = vpop.permute.xlu0 %802 }
 0xf16   :  { %v805_v10 = vmul.f32 %v2611_v5, %v803_v6 }
 0xf18   :  { %807 = vrot.lane.b32.xlu1 %v805_v10, %s2698_s3 }
 0xf8a   :  { %v808_v9 = vpop.permute.xlu1 %807 }
 0xf8b   :  { %v810_v57 = vadd.f32 %v808_v9, %v800_v7 }
 0xf8d   :  { %2612 = vtanh.f32 %v810_v57 }
 0xf97   :  { %v2613_v15 = vpop.eup %2612 }
 0xf98   :  { %813 = vrot.lane.b32.xlu0 %v2613_v15, %s2697_s23 }
0x100a   :  { %v814_v16 = vpop.permute.xlu0 %813 }
0x100b   :  { %v816_v17 = vmul.f32 %v2611_v5, %v814_v16 }
0x100d   :  { %818 = vrot.lane.b32.xlu1 %v816_v17, %s2698_s3 }
0x107f   :  { %v819_v21 = vpop.permute.xlu1 %818 }
0x1080   :  { %821 = vst.msk [vmem:[#allocation2 + $0x28] sm:$0xff] %vm188_vm3, %v819_v21  ;;  %2319 = vmatmul.mubr.msk.f32.vlgmr.msra.gmra.mrb[12].mxu0 %vm188_vm3, %v819_v21 }
0x1081   :  { %2502 = vmatpush3.bf16.msra.mxu0 %v2499_v14  ;;  %2340 = vmatprep.mubr.msk.f32.mxu0 %vm188_vm3, %v1034_v22 }
0x1082   :  { %2504 = vmatprep.subr.bf16.mxu0 %v2503_v20 }
0x1085   :  { %2506 = vmatpush3.bf16.msra.mxu0 %v2503_v20 }
0x1086   :  { %2519 = vmatprep.subr.bf16.mxu0 %v2694_v0 }
0x1087   :  { %v1039_v27 = vld [vmem:[#allocation2 + $0x28] sm:$0xff] }
0x1088   :  { %2341 = vmatmul.mubr.msk.f32.vlgmr.msra.gmra.mrb[14].mxu0 %vm188_vm3, %v1035_v23 }
0x1089   :  { %2343 = vmatprep.mubr.msk.f32.mxu0 %vm188_vm3, %v1036_v24  ;;  %2521 = vmatpush3.bf16.msra.mxu0 %v2952_v50 }
0x108a   :  { %2522 = vmatprep.subr.bf16.mxu0 %v2694_v0 }
0x108c   :  { %2344 = vmatmul.mubr.msk.f32.gmra.mrb[16].mxu0 %vm188_vm3, %v1037_v25 }
0x108d   :  { %2346 = vmatprep.mubr.msk.f32.mxu0 %vm188_vm3, %v1038_v26  ;;  %2524 = vmatpush3.bf16.msra.mxu0 %v2962_v53 }
0x108e   :  { %2531 = vmatprep.subr.bf16.mxu0 %v2694_v0 }
0x1090   :  { %2347 = vmatmul.mubr.msk.f32.gmra.mrb[18].mxu0 %vm188_vm3, %v1039_v27 }
0x1153   :  { %v894_v29 = vpop.f32.mrb[12].mxu0 }
0x1154   :  { %v898_v30 = vadd.f32 %v894_v29, %v176_v28  ;;  %v2320_v31 = vpop.f32.mrb[13].mxu0 }
0x1156   :  { %2614 = vtanh.f32 %v898_v30  ;;  %v2095_v39 = vmul.f32 -1.442695, %v898_v30 }
0x1158   :  { %2616 = vpow2.f32 %v2095_v39 }
0x115b   :  { %v2930_v32 = vpop.f32.mrb[14].mxu0 }
0x115c   :  { %v1143_v33 = vpop.f32.mrb[15].mxu0 }
0x115d   :  { %v1144_v2 = vadd.f32 %v2988_v4, %v1143_v33 }
0x115f   :  { %v2932_v34 = vpop.f32.mrb[16].mxu0 }
0x1160   :  { %v2615_v35 = vpop.eup %2614  ;;  %v2934_v36 = vpop.f32.mrb[17].mxu0 }
0x1161   :  { %908 = vrot.lane.b32.xlu0 %v2615_v35, %s2697_s23  ;;  %v1149_v35 = vadd.f32 %v2930_v32, %v2988_v4 }
0x1162   :  { %v2617_v60 = vpop.eup %2616 }
0x1163   :  { %v2937_v37 = vpop.f32.mrb[18].mxu0  ;;  %v902_v40 = vadd.f32 1.0, %v2617_v60 }
0x1164   :  { %v2939_v38 = vpop.f32.mrb[19].mxu0 }
0x1165   :  { %2618 = vrcp.f32 %v902_v40 }
0x116f   :  { %v2619_v41 = vpop.eup %2618 }
0x1170   :  { %v906_v44 = vmul.f32 %v2619_v41, %v810_v57 }
0x11d3   :  { %v909_v42 = vpop.permute.xlu0 %908 }
0x11d4   :  { %v911_v43 = vmul.f32 %v2619_v41, %v909_v42 }
0x11d6   :  { %913 = vrot.lane.b32.xlu1 %v911_v43, %s2698_s3 }
0x1248   :  { %v914_v45 = vpop.permute.xlu1 %913 }
0x1249   :  { %v2942_v46 = vadd.f32 %v914_v45, %v906_v44 }
0x124b   :  { %2620 = vtanh.f32 %v2942_v46 }
0x1255   :  { %v2621_v47 = vpop.eup %2620 }
0x1256   :  { %919 = vrot.lane.b32.xlu0 %v2621_v47, %s2697_s23 }
0x12c8   :  { %v920_v54 = vpop.permute.xlu0 %919 }
0x12c9   :  { %v922_v55 = vmul.f32 %v2619_v41, %v920_v54 }
0x12cb   :  { %924 = vrot.lane.b32.xlu1 %v922_v55, %s2698_s3 }
0x133d   :  { %v925_v56 = vpop.permute.xlu1 %924 }
0x133e   :  { %927 = vst.msk [vmem:[#allocation2 + $0x30] sm:$0xff] %vm188_vm3, %v925_v56  ;;  %2330 = vmatmul.mubr.msk.f32.vlgmr.msra.gmra.mrb[8].mxu1 %vm188_vm3, %v925_v56 }
0x133f   :  { %2509 = vmatpush3.bf16.msra.mxu1 %v2952_v50  ;;  %2360 = vmatprep.mubr.msk.f32.mxu1 %vm2695_vm2, %v2696_v8 }
0x1340   :  { %2510 = vmatprep.subr.bf16.mxu1 %v2694_v0 }
0x1343   :  { %2512 = vmatpush3.bf16.msra.mxu1 %v2962_v53 }
0x1344   :  { %2513 = vmatprep.subr.bf16.mxu1 %v2694_v0 }
0x1345   :  { %v1040_v58 = vld [vmem:[#allocation2 + $0x30] sm:$0xff] }
0x1346   :  { %2361 = vmatmul.mubr.f32.vlgmr.msra.gmra.mrb[10].mxu1 %v2696_v8  ;;  %2349 = vmatprep.mubr.msk.f32.mxu0 %vm188_vm3, %v1040_v58 }
0x1347   :  { %2515 = vmatpush3.bf16.msra.mxu1 %v2952_v50  ;;  %2371 = vmatprep.mubr.msk.f32.mxu1 %vm2695_vm2, %v2696_v8 }
0x1348   :  { %2516 = vmatprep.subr.bf16.mxu1 %v2694_v0 }
0x134b   :  { %2518 = vmatpush3.bf16.msra.mxu1 %v2962_v53 }
0x134c   :  { %2525 = vmatprep.subr.bf16.mxu1 %v2694_v0 }
0x1411   :  { %v1000_v62 = vpop.f32.mrb[8].mxu1 }
0x1412   :  { %v1004_v63 = vadd.f32 %v1000_v62, %v181_v61  ;;  %v2331_v1 = vpop.f32.mrb[9].mxu1 }
0x1414   :  { %v2097_v18 = vmul.f32 -1.442695, %v1004_v63 }
0x1419   :  { %v1252_v3 = vpop.f32.mrb[10].mxu1 }
0x141a   :  { %v1256_v5 = vadd.f32 %v1252_v3, %v1144_v2  ;;  %v2362_v6 = vpop.f32.mrb[11].mxu1 }
0x141c   :  { %2622 = vtanh.f32 %v1256_v5  ;;  %v2107_v7 = vmul.f32 -1.442695, %v1256_v5 }
0x141e   :  { %2624 = vpow2.f32 %v2107_v7 }
0x1426   :  { %v2623_v10 = vpop.eup %2622 }
0x1427   :  { %1266 = vrot.lane.b32.xlu0 %v2623_v10, %s2697_s23 }
0x1428   :  { %v2625_v12 = vpop.eup %2624 }
0x1429   :  { %v1260_v59 = vadd.f32 1.0, %v2625_v12 }
0x142b   :  { %2626 = vrcp.f32 %v1260_v59 }
0x1435   :  { %v2627_v9 = vpop.eup %2626 }
0x1436   :  { %v1264_v13 = vmul.f32 0.0, %v2627_v9 }
0x1499   :  { %v1267_v57 = vpop.permute.xlu0 %1266 }
0x149a   :  { %v1269_v11 = vmul.f32 %v2627_v9, %v1267_v57 }
0x149c   :  { %1271 = vrot.lane.b32.xlu1 %v1269_v11, %s2698_s3 }
0x150e   :  { %v1272_v14 = vpop.permute.xlu1 %1271 }
0x150f   :  { %v1274_v15 = vadd.f32 %v1272_v14, %v1264_v13 }
0x1511   :  { %2628 = vtanh.f32 %v1274_v15 }
0x1512   :  { %2630 = vtanh.f32 %v1004_v63  ;;  %v1154_v63 = vadd.f32 %v2988_v4, %v2934_v36 }
0x1513   :  { %2632 = vpow2.f32 %v2097_v18 }
0x151b   :  { %v2629_v16 = vpop.eup %2628 }
0x151c   :  { %1277 = vrot.lane.b32.xlu0 %v2629_v16, %s2697_s23  ;;  %v2631_v17 = vpop.eup %2630 }
0x151d   :  { %v2633_v19 = vpop.eup %2632 }
0x151e   :  { %v1008_v20 = vadd.f32 1.0, %v2633_v19 }
0x1520   :  { %1014 = vrot.lane.b32.xlu0 %v2631_v17, %s2697_s23  ;;  %2634 = vrcp.f32 %v1008_v20  ;;  %v1159_v17 = vadd.f32 %v2932_v34, %v2988_v4 }
0x152a   :  { %v2635_v23 = vpop.eup %2634 }
0x152b   :  { %v1012_v27 = vmul.f32 %v2635_v23, %v2942_v46 }
0x158e   :  { %v1278_v21 = vpop.permute.xlu0 %1277 }
0x158f   :  { %v1280_v22 = vmul.f32 %v2627_v9, %v1278_v21 }
0x1591   :  { %1282 = vrot.lane.b32.xlu1 %v1280_v22, %s2698_s3 }
0x1592   :  { %v1015_v24 = vpop.permute.xlu0 %1014 }
0x1593   :  { %v1017_v25 = vmul.f32 %v2635_v23, %v1015_v24 }
0x1595   :  { %1019 = vrot.lane.b32.xlu0 %v1017_v25, %s2698_s3 }
0x1603   :  { %v1283_v26 = vpop.permute.xlu1 %1282 }
0x1604   :  { %2372 = vmatmul.mubr.msk.f32.vlgmr.msra.gmra.mrb[12].mxu1 %vm188_vm3, %v1283_v26 }
0x1605   :  { %2527 = vmatpush3.bf16.msra.mxu1 %v2952_v50  ;;  %2393 = vmatprep.mubr.msk.f32.mxu1 %vm2695_vm2, %v2696_v8 }
0x1606   :  { %2528 = vmatprep.subr.bf16.mxu1 %v2694_v0 }
0x1607   :  { %v1020_v28 = vpop.permute.xlu0 %1019 }
0x1608   :  { %v1022_v29 = vadd.f32 %v1020_v28, %v1012_v27 }
0x1609   :  { %2530 = vmatpush3.bf16.msra.mxu1 %v2962_v53 }
0x160a   :  { %2636 = vtanh.f32 %v1022_v29  ;;  %2537 = vmatprep.subr.bf16.mxu1 %v2694_v0 }
0x1614   :  { %v2637_v30 = vpop.eup %2636 }
0x1615   :  { %1025 = vrot.lane.b32.xlu0 %v2637_v30, %s2697_s23 }
0x1687   :  { %v1026_v31 = vpop.permute.xlu0 %1025 }
0x1688   :  { %v1028_v33 = vmul.f32 %v2635_v23, %v1026_v31 }
0x168a   :  { %1030 = vrot.lane.b32.xlu0 %v1028_v33, %s2698_s3 }
0x16d7   :  { %v1352_v39 = vpop.f32.mrb[12].mxu1 }
0x16d8   :  { %v1356_v60 = vadd.f32 %v1352_v39, %v1149_v35  ;;  %v2373_v40 = vpop.f32.mrb[13].mxu1  ;;  %v1164_v39 = vadd.f32 %v2988_v4, %v2939_v38 }
0x16da   :  { %2638 = vtanh.f32 %v1356_v60  ;;  %v2109_v44 = vmul.f32 -1.442695, %v1356_v60 }
0x16dc   :  { %2640 = vpow2.f32 %v2109_v44 }
0x16e4   :  { %v2639_v41 = vpop.eup %2638 }
0x16e5   :  { %1366 = vrot.lane.b32.xlu1 %v2639_v41, %s2697_s23 }
0x16e6   :  { %v2641_v45 = vpop.eup %2640 }
0x16e7   :  { %v1360_v32 = vadd.f32 1.0, %v2641_v45 }
0x16e9   :  { %2642 = vrcp.f32 %v1360_v32 }
0x16f3   :  { %v2643_v46 = vpop.eup %2642 }
0x16f4   :  { %v1364_v49 = vmul.f32 %v2643_v46, %v1274_v15 }
0x16fc   :  { %v1031_v42 = vpop.permute.xlu0 %1030 }
0x16fd   :  { %1033 = vst.msk [vmem:[#allocation2 + $0x38] sm:$0xff] %vm188_vm3, %v1031_v42 }
0x1704   :  { %v1041_v43 = vld [vmem:[#allocation2 + $0x38] sm:$0xff] }
0x1705   :  { %2350 = vmatmul.mubr.msk.f32.gmra.mrb[20].mxu0 %vm188_vm3, %v1041_v43 }
0x1706   :  { %2382 = vmatprep.mubr.msk.f32.mxu0 %vm2695_vm2, %v2696_v8 }
0x1757   :  { %v1367_v47 = vpop.permute.xlu1 %1366 }
0x1758   :  { %v1369_v48 = vmul.f32 %v2643_v46, %v1367_v47 }
0x175a   :  { %1371 = vrot.lane.b32.xlu1 %v1369_v48, %s2698_s3 }
0x17cc   :  { %v1372_v51 = vpop.permute.xlu1 %1371 }
0x17cd   :  { %v1374_v52 = vadd.f32 %v1372_v51, %v1364_v49 }
0x17cf   :  { %2644 = vtanh.f32 %v1374_v52 }
0x17d8   :  { %v3015_v54 = vpop.f32.mrb[20].mxu0 }
0x17d9   :  { %v2645_v55 = vpop.eup %2644  ;;  %v3017_v56 = vpop.f32.mrb[21].mxu0 }
0x17da   :  { %1377 = vrot.lane.b32.xlu1 %v2645_v55, %s2697_s23 }
0x184c   :  { %v1378_v58 = vpop.permute.xlu1 %1377 }
0x184d   :  { %v1380_v61 = vmul.f32 %v2643_v46, %v1378_v58 }
0x184f   :  { %1382 = vrot.lane.b32.xlu1 %v1380_v61, %s2698_s3  ;;  %v1169_v61 = vadd.f32 %v2937_v37, %v2988_v4 }
0x18c1   :  { %v1383_v62 = vpop.permute.xlu1 %1382 }
0x18c2   :  { %2383 = vmatmul.mubr.msk.f32.vlgmr.msra.gmra.mrb[22].mxu0 %vm188_vm3, %v1383_v62 }
0x18c3   :  { %2533 = vmatpush3.bf16.msra.mxu0 %v2952_v50  ;;  %2404 = vmatprep.mubr.msk.f32.mxu0 %vm2695_vm2, %v2696_v8 }
0x18c4   :  { %2534 = vmatprep.subr.bf16.mxu0 %v2694_v0 }
0x18c7   :  { %2536 = vmatpush3.bf16.msra.mxu0 %v2962_v53 }
0x18c8   :  { %2543 = vmatprep.subr.bf16.mxu0 %v2694_v0 }
0x1995   :  { %v1452_v1 = vpop.f32.mrb[22].mxu0 }
0x1996   :  { %v1456_v2 = vadd.f32 %v1452_v1, %v1154_v63  ;;  %v2384_v3 = vpop.f32.mrb[23].mxu0 }
0x1998   :  { %2646 = vtanh.f32 %v1456_v2  ;;  %v2111_v6 = vmul.f32 -1.442695, %v1456_v2 }
0x199a   :  { %2648 = vpow2.f32 %v2111_v6 }
0x19a2   :  { %v2647_v5 = vpop.eup %2646 }
0x19a3   :  { %1466 = vrot.lane.b32.xlu0 %v2647_v5, %s2697_s23 }
0x19a4   :  { %v2649_v10 = vpop.eup %2648 }
0x19a5   :  { %v1460_v7 = vadd.f32 1.0, %v2649_v10 }
0x19a7   :  { %2650 = vrcp.f32 %v1460_v7 }
0x19b1   :  { %v2651_v12 = vpop.eup %2650 }
0x19b2   :  { %v1464_v57 = vmul.f32 %v2651_v12, %v1374_v52 }
0x1a15   :  { %v1467_v59 = vpop.permute.xlu0 %1466 }
0x1a16   :  { %v1469_v9 = vmul.f32 %v2651_v12, %v1467_v59 }
0x1a18   :  { %1471 = vrot.lane.b32.xlu1 %v1469_v9, %s2698_s3 }
0x1a8a   :  { %v1472_v11 = vpop.permute.xlu1 %1471 }
0x1a8b   :  { %v1474_v36 = vadd.f32 %v1472_v11, %v1464_v57 }
0x1a8d   :  { %2652 = vtanh.f32 %v1474_v36 }
0x1a97   :  { %v2653_v13 = vpop.eup %2652 }
0x1a98   :  { %1477 = vrot.lane.b32.xlu0 %v2653_v13, %s2697_s23 }
0x1b0a   :  { %v1478_v14 = vpop.permute.xlu0 %1477 }
0x1b0b   :  { %v1480_v15 = vmul.f32 %v2651_v12, %v1478_v14 }
0x1b0d   :  { %1482 = vrot.lane.b32.xlu1 %v1480_v15, %s2698_s3 }
0x1b7f   :  { %v1483_v16 = vpop.permute.xlu1 %1482 }
0x1b80   :  { %2394 = vmatmul.mubr.msk.f32.vlgmr.msra.gmra.mrb[14].mxu1 %vm188_vm3, %v1483_v16 }
0x1b81   :  { %2539 = vmatpush3.bf16.msra.mxu1 %v2952_v50  ;;  %2415 = vmatprep.mubr.msk.f32.mxu1 %vm2695_vm2, %v2696_v8 }
0x1b82   :  { %2540 = vmatprep.subr.bf16.mxu1 %v2694_v0 }
0x1b85   :  { %2542 = vmatpush3.bf16.msra.mxu1 %v2962_v53 }
0x1b86   :  { %2549 = vmatprep.subr.bf16.mxu1 %v2694_v0 }
0x1c53   :  { %v1552_v18 = vpop.f32.mrb[14].mxu1 }
0x1c54   :  { %v1556_v19 = vadd.f32 %v1552_v18, %v1159_v17  ;;  %v2395_v20 = vpop.f32.mrb[15].mxu1 }
0x1c56   :  { %2654 = vtanh.f32 %v1556_v19  ;;  %v2113_v22 = vmul.f32 -1.442695, %v1556_v19 }
0x1c58   :  { %2656 = vpow2.f32 %v2113_v22 }
0x1c60   :  { %v2655_v21 = vpop.eup %2654 }
0x1c61   :  { %1566 = vrot.lane.b32.xlu0 %v2655_v21, %s2697_s23 }
0x1c62   :  { %v2657_v23 = vpop.eup %2656 }
0x1c63   :  { %v1560_v24 = vadd.f32 1.0, %v2657_v23 }
0x1c65   :  { %2658 = vrcp.f32 %v1560_v24 }
0x1c6f   :  { %v2659_v25 = vpop.eup %2658 }
0x1c70   :  { %v1564_v28 = vmul.f32 %v2659_v25, %v1474_v36  ;;  %v1174_v36 = vadd.f32 %v2988_v4, %v3017_v56 }
0x1cd3   :  { %v1567_v26 = vpop.permute.xlu0 %1566 }
0x1cd4   :  { %v1569_v27 = vmul.f32 %v2659_v25, %v1567_v26 }
0x1cd6   :  { %1571 = vrot.lane.b32.xlu1 %v1569_v27, %s2698_s3 }
0x1d48   :  { %v1572_v29 = vpop.permute.xlu1 %1571 }
0x1d49   :  { %v1574_v34 = vadd.f32 %v1572_v29, %v1564_v28  ;;  %v1179_v28 = vadd.f32 %v3015_v54, %v2988_v4  ;;  %v1981_v54 = vld [vmem:[%s3115_s7] sm:$0xff] }
0x1d4b   :  { %2660 = vtanh.f32 %v1574_v34 }
0x1d55   :  { %v2661_v30 = vpop.eup %2660 }
0x1d56   :  { %1577 = vrot.lane.b32.xlu0 %v2661_v30, %s2697_s23 }
0x1dc8   :  { %v1578_v31 = vpop.permute.xlu0 %1577 }
0x1dc9   :  { %v1580_v33 = vmul.f32 %v2659_v25, %v1578_v31 }
0x1dcb   :  { %1582 = vrot.lane.b32.xlu1 %v1580_v33, %s2698_s3 }
0x1e3d   :  { %v1583_v35 = vpop.permute.xlu1 %1582 }
0x1e3e   :  { %2405 = vmatmul.mubr.msk.f32.vlgmr.msra.gmra.mrb[24].mxu0 %vm188_vm3, %v1583_v35 }
0x1e3f   :  { %2545 = vmatpush3.bf16.msra.mxu0 %v2952_v50  ;;  %2426 = vmatprep.mubr.msk.f32.mxu0 %vm2695_vm2, %v2696_v8 }
0x1e40   :  { %2546 = vmatprep.subr.bf16.mxu0 %v2694_v0 }
0x1e43   :  { %2548 = vmatpush3.bf16.msra.mxu0 %v2962_v53 }
0x1e44   :  { %2555 = vmatprep.subr.bf16.mxu0 %v2694_v0 }
0x1f11   :  { %v1652_v60 = vpop.f32.mrb[24].mxu0 }
0x1f12   :  { %v1656_v40 = vadd.f32 %v1652_v60, %v1164_v39  ;;  %v2406_v41 = vpop.f32.mrb[25].mxu0 }
0x1f14   :  { %2662 = vtanh.f32 %v1656_v40  ;;  %v2115_v43 = vmul.f32 -1.442695, %v1656_v40 }
0x1f16   :  { %2664 = vpow2.f32 %v2115_v43 }
0x1f1e   :  { %v2663_v42 = vpop.eup %2662 }
0x1f1f   :  { %1666 = vrot.lane.b32.xlu0 %v2663_v42, %s2697_s23 }
0x1f20   :  { %v2665_v44 = vpop.eup %2664 }
0x1f21   :  { %v1660_v45 = vadd.f32 1.0, %v2665_v44  ;;  %v1982_v44 = vld [vmem:[%s3115_s7 + $0x8] sm:$0xff] }
0x1f23   :  { %2666 = vrcp.f32 %v1660_v45  ;;  %v1983_v45 = vld [vmem:[%s3115_s7 + $0x10] sm:$0xff] }
0x1f2d   :  { %v2667_v32 = vpop.eup %2666 }
0x1f2e   :  { %v1664_v48 = vmul.f32 %v2667_v32, %v1574_v34 }
0x1f91   :  { %v1667_v46 = vpop.permute.xlu0 %1666 }
0x1f92   :  { %v1669_v47 = vmul.f32 %v2667_v32, %v1667_v46  ;;  %v1984_v46 = vld [vmem:[%s3115_s7 + $0x18] sm:$0xff] }
0x1f94   :  { %1671 = vrot.lane.b32.xlu1 %v1669_v47, %s2698_s3  ;;  %v2559_v47 = vpack.c.bf16 %v1984_v46, %v1983_v45 }
0x2006   :  { %v1672_v49 = vpop.permute.xlu1 %1671 }
0x2007   :  { %v1674_v38 = vadd.f32 %v1672_v49, %v1664_v48  ;;  %v14_v49 = vstv %s3116_s8 }
0x2008   :  { %15 = vst [vmem:[#allocation3] sm:$0x1] %v14_v49 }
0x2009   :  { %2668 = vtanh.f32 %v1674_v38 }
0x2013   :  { %v2669_v51 = vpop.eup %2668 }
0x2014   :  { %1677 = vrot.lane.b32.xlu0 %v2669_v51, %s2697_s23 }
0x2086   :  { %v1678_v52 = vpop.permute.xlu0 %1677 }
0x2087   :  { %v1680_v55 = vmul.f32 %v2667_v32, %v1678_v52  ;;  %v2556_v32 = vpack.c.bf16 %v1982_v44, %v1981_v54 }
0x2089   :  { %1682 = vrot.lane.b32.xlu1 %v1680_v55, %s2698_s3  ;;  %v2122_v55 = vld [vmem:[#allocation3] ss:$0 sm:$0xff] }
0x20fb   :  { %v1683_v58 = vpop.permute.xlu1 %1682 }
0x20fc   :  { %2416 = vmatmul.mubr.msk.f32.vlgmr.msra.gmra.mrb[16].mxu1 %vm188_vm3, %v1683_v58 }
0x20fd   :  { %2551 = vmatpush3.bf16.msra.mxu1 %v2952_v50  ;;  %2437 = vmatprep.mubr.msk.f32.mxu1 %vm2695_vm2, %v2696_v8 }
0x20fe   :  { %2552 = vmatprep.subr.bf16.mxu1 %v2694_v0 }
0x2101   :  { %2554 = vmatpush3.bf16.msra.mxu1 %v2962_v53 }
0x21cf   :  { %v1752_v62 = vpop.f32.mrb[16].mxu1 }
0x21d0   :  { %v1756_v63 = vadd.f32 %v1752_v62, %v1169_v61  ;;  %v2417_v1 = vpop.f32.mrb[17].mxu1 }
0x21d2   :  { %2670 = vtanh.f32 %v1756_v63  ;;  %v2117_v3 = vmul.f32 -1.442695, %v1756_v63 }
0x21d4   :  { %2672 = vpow2.f32 %v2117_v3 }
0x21dc   :  { %v2671_v2 = vpop.eup %2670 }
0x21dd   :  { %1766 = vrot.lane.b32.xlu0 %v2671_v2, %s2697_s23 }
0x21de   :  { %v2673_v50 = vpop.eup %2672 }
0x21df   :  { %v1760_v5 = vadd.f32 1.0, %v2673_v50 }
0x21e1   :  { %2674 = vrcp.f32 %v1760_v5 }
0x21eb   :  { %v2675_v6 = vpop.eup %2674 }
0x21ec   :  { %v1764_v53 = vmul.f32 %v2675_v6, %v1674_v38 }
0x224f   :  { %v1767_v10 = vpop.permute.xlu0 %1766 }
0x2250   :  { %v1769_v7 = vmul.f32 %v2675_v6, %v1767_v10 }
0x2252   :  { %1771 = vrot.lane.b32.xlu1 %v1769_v7, %s2698_s3 }
0x22c4   :  { %v1772_v12 = vpop.permute.xlu1 %1771 }
0x22c5   :  { %v1774_v37 = vadd.f32 %v1772_v12, %v1764_v53 }
0x22c7   :  { %2676 = vtanh.f32 %v1774_v37 }
0x22d1   :  { %v2677_v59 = vpop.eup %2676 }
0x22d2   :  { %1777 = vrot.lane.b32.xlu0 %v2677_v59, %s2697_s23 }
0x2344   :  { %v1778_v9 = vpop.permute.xlu0 %1777 }
0x2345   :  { %v1780_v57 = vmul.f32 %v2675_v6, %v1778_v9 }
0x2347   :  { %1782 = vrot.lane.b32.xlu1 %v1780_v57, %s2698_s3 }
0x23b9   :  { %v1783_v11 = vpop.permute.xlu1 %1782 }
0x23ba   :  { %2427 = vmatmul.mubr.msk.f32.vlgmr.msra.gmra.mrb[26].mxu0 %vm188_vm3, %v1783_v11 }
0x23bb   :  { %2448 = vmatprep.mubr.msk.f32.mxu0 %vm2695_vm2, %v2696_v8  ;;  %2557 = vmatpush3.bf16.msra.mxu0 %v2556_v32 }
0x23bc   :  { %2558 = vmatprep.subr.bf16.mxu0 %v2694_v0 }
0x23bf   :  { %2560 = vmatpush3.bf16.msra.mxu0 %v2559_v47 }
0x248d   :  { %v1852_v13 = vpop.f32.mrb[26].mxu0 }
0x248e   :  { %v1856_v14 = vadd.f32 %v1852_v13, %v1174_v36  ;;  %v2428_v15 = vpop.f32.mrb[27].mxu0 }
0x2490   :  { %2678 = vtanh.f32 %v1856_v14  ;;  %v2119_v17 = vmul.f32 -1.442695, %v1856_v14 }
0x2492   :  { %2680 = vpow2.f32 %v2119_v17 }
0x249a   :  { %v2679_v16 = vpop.eup %2678 }
0x249b   :  { %1866 = vrot.lane.b32.xlu0 %v2679_v16, %s2697_s23 }
0x249c   :  { %v2681_v18 = vpop.eup %2680 }
0x249d   :  { %v1860_v19 = vadd.f32 1.0, %v2681_v18 }
0x249f   :  { %2682 = vrcp.f32 %v1860_v19 }
0x24a9   :  { %v2683_v20 = vpop.eup %2682 }
0x24aa   :  { %v1864_v8 = vmul.f32 %v2683_v20, %v1774_v37 }
0x250d   :  { %v1867_v21 = vpop.permute.xlu0 %1866 }
0x250e   :  { %v1869_v22 = vmul.f32 %v2683_v20, %v1867_v21 }
0x2510   :  { %1871 = vrot.lane.b32.xlu1 %v1869_v22, %s2698_s3 }
0x2582   :  { %v1872_v23 = vpop.permute.xlu1 %1871 }
0x2583   :  { %v1874_v56 = vadd.f32 %v1872_v23, %v1864_v8 }
0x2585   :  { %2684 = vtanh.f32 %v1874_v56 }
0x258f   :  { %v2685_v24 = vpop.eup %2684 }
0x2590   :  { %1877 = vrot.lane.b32.xlu0 %v2685_v24, %s2697_s23 }
0x2602   :  { %v1878_v25 = vpop.permute.xlu0 %1877 }
0x2603   :  { %v1880_v26 = vmul.f32 %v2683_v20, %v1878_v25 }
0x2605   :  { %1882 = vrot.lane.b32.xlu1 %v1880_v26, %s2698_s3 }
0x2677   :  { %v1883_v27 = vpop.permute.xlu1 %1882 }
0x2678   :  { %2438 = vmatmul.mubr.msk.f32.vlgmr.msra.gmra.mrb[18].mxu1 %vm188_vm3, %v1883_v27 }
0x274b   :  { %v1952_v29 = vpop.f32.mrb[18].mxu1 }
0x274c   :  { %v1956_v34 = vadd.f32 %v1952_v29, %v1179_v28  ;;  %v2439_v30 = vpop.f32.mrb[19].mxu1 }
0x274e   :  { %2686 = vtanh.f32 %v1956_v34  ;;  %v2121_v33 = vmul.f32 -1.442695, %v1956_v34 }
0x2750   :  { %2688 = vpow2.f32 %v2121_v33 }
0x2758   :  { %v2687_v31 = vpop.eup %2686 }
0x2759   :  { %1966 = vrot.lane.b32.xlu0 %v2687_v31, %s2697_s23 }
0x275a   :  { %v2689_v35 = vpop.eup %2688 }
0x275b   :  { %v1960_v39 = vadd.f32 1.0, %v2689_v35 }
0x275d   :  { %2690 = vrcp.f32 %v1960_v39 }
0x2767   :  { %v2691_v60 = vpop.eup %2690 }
0x2768   :  { %v1964_v42 = vmul.f32 %v2691_v60, %v1874_v56 }
0x27cb   :  { %v1967_v40 = vpop.permute.xlu0 %1966 }
0x27cc   :  { %v1969_v41 = vmul.f32 %v2691_v60, %v1967_v40 }
0x27ce   :  { %1971 = vrot.lane.b32.xlu1 %v1969_v41, %s2698_s3 }
0x2840   :  { %v1972_v43 = vpop.permute.xlu1 %1971 }
0x2841   :  { %v1974_v4 = vadd.f32 %v1972_v43, %v1964_v42 }
0x2843   :  { %2692 = vtanh.f32 %v1974_v4 }
0x284d   :  { %v2693_v48 = vpop.eup %2692 }
0x284e   :  { %1977 = vrot.lane.b32.xlu0 %v2693_v48, %s2697_s23 }
0x28c0   :  { %v1978_v38 = vpop.permute.xlu0 %1977 }
0x28c1   :  { %v1980_v51 = vmul.f32 %v2691_v60, %v1978_v38 }
0x28c3   :  { %1993 = vrot.lane.b32.xlu1 %v1980_v51, %s2698_s3 }
0x2935   :  { %v1994_v52 = vpop.permute.xlu1 %1993 }
0x2936   :  { %2449 = vmatmul.mubr.msk.f32.vlgmr.msra.gmra.mrb[28].mxu0 %vm188_vm3, %v1994_v52 }
0x2a09   :  { %v2063_v58 = vpop.f32.mrb[28].mxu0 }
0x2a0a   :  { %v2064_v0 = vadd.f32 %v2122_v55, %v2063_v58  ;;  %v2450_v61 = vpop.f32.mrb[29].mxu0 }
0x2a0c   :  { %2068 = vst.msk [vmem:[%s3117_s9] sm:$0xff] %vm2067_vm4, %v2064_v0 }

</bundles_post_ra>
